<compile_context>
chip_gen: v7x
topology: tpu7x:2x2x1
jax: 0.10.0
libtpu: 0.0.40
codegen_flags: <defaults>
</compile_context>

<pallas_src>
import functools

import jax
import jax.numpy as jnp
import numpy as np
from jax.experimental import pallas as pl
from jax.experimental.pallas import tpu as pltpu


# Whole-array-in-VMEM block spec (kernel runs without a grid; all operands are
# small enough to be fully VMEM-resident).
_VMEM_SPEC = pl.BlockSpec(memory_space=pltpu.MemorySpace.VMEM)


def _sigmoid(x):
    # sigmoid(x) = 0.5 * (1 + tanh(x/2)) -> single EUP op per element instead
    # of exp + reciprocal.
    return 0.5 * (jnp.tanh(0.5 * x) + 1.0)


# ----------------------------------------------------------------------------
# Single fused Pallas kernel: all LSTM layers + fc(relu(h_T)) head
# ----------------------------------------------------------------------------
def _lstm_net_kernel(x_ref, h0_ref, c0_ref, *refs,
                     seq_len, n_layers, hidden_dim, batch):
    """Fused LSTMNet forward.

    x_ref  : (T*B, D0)            time-major, row-flattened input
    h0_ref : (n_layers, B, H)     initial hidden states
    c0_ref : (n_layers, B, H)     initial cell states
    refs   : per layer (wih_t (D_l,4H), whh_t (H,4H), bias (1,4H)),
             then fc_w_t (H, O), fc_b (1, O),
             then outputs: out (B, O), hT (n_layers, B, H), cT (n_layers, B, H)
    """
    H = hidden_dim
    B = batch

    w_refs = refs[:3 * n_layers]
    fcw_ref = refs[3 * n_layers]
    fcb_ref = refs[3 * n_layers + 1]
    out_ref, hT_ref, cT_ref = refs[3 * n_layers + 2:]

    layer_in = x_ref[...].astype(jnp.float32)          # [T*B, D_0]

    h = None
    for l in range(n_layers):
        wih = w_refs[3 * l][...]                        # [D_l, 4H]
        whh = w_refs[3 * l + 1][...]                    # [H, 4H]
        bias = w_refs[3 * l + 2][...]                   # [1, 4H]

        # Hoisted input projection for ALL time steps: one big MXU GEMM.
        gx = jnp.dot(layer_in, wih,
                     preferred_element_type=jnp.float32) + bias   # [T*B, 4H]

        h = h0_ref[l].astype(jnp.float32)               # [B, H]
        c = c0_ref[l].astype(jnp.float32)
        hs = []
        for t in range(seq_len):                        # static unroll
            gates = gx[t * B:(t + 1) * B, :] + jnp.dot(
                h, whh, preferred_element_type=jnp.float32)
            i_g = _sigmoid(gates[:, 0 * H:1 * H])
            f_g = _sigmoid(gates[:, 1 * H:2 * H])
            g_g = jnp.tanh(gates[:, 2 * H:3 * H])
            o_g = _sigmoid(gates[:, 3 * H:4 * H])
            c = f_g * c + i_g * g_g
            h = o_g * jnp.tanh(c)
            if l < n_layers - 1:
                hs.append(h)

        hT_ref[l] = h.astype(hT_ref.dtype)
        cT_ref[l] = c.astype(cT_ref.dtype)
        if l < n_layers - 1:
            # Next layer's time-major flattened input, kept entirely in VMEM.
            layer_in = jnp.concatenate(hs, axis=0)      # [T*B, H]

    # Fused head: out = relu(h_T_lastlayer) @ fc_w^T + fc_b
    out_ref[...] = (
        jnp.dot(jnp.maximum(h, 0.0), fcw_ref[...],
                preferred_element_type=jnp.float32)
        + fcb_ref[...]
    ).astype(out_ref.dtype)


# ----------------------------------------------------------------------------
# Wrapper
# ----------------------------------------------------------------------------
@functools.partial(jax.jit, static_argnames=("n_layers",))
def lstm_net_forward(x, h0, c0, params, *, n_layers):
    """Equivalent of LSTMNet.forward(x, (h0, c0)) in eval mode.

    x  : [B, T, input_dim]  (batch_first, like PyTorch)
    h0 : [n_layers, B, H]
    c0 : [n_layers, B, H]
    returns (out [B, output_dim], (h [n_layers, B, H], c [n_layers, B, H]))
    """
    B, T, _ = x.shape
    H = h0.shape[-1]
    O = params["fc_w_t"].shape[-1]

    # Time-major, row-flattened: [T*B, D] so the hoisted input GEMM has M=T*B.
    x_flat = jnp.transpose(x, (1, 0, 2)).reshape(T * B, -1)

    weight_args = []
    for l in range(n_layers):
        wih_t, whh_t, bias = params["lstm"][l]
        weight_args += [wih_t, whh_t, bias]

    kernel = functools.partial(_lstm_net_kernel, seq_len=T, n_layers=n_layers,
                               hidden_dim=H, batch=B)
    n_in = 3 + 3 * n_layers + 2

    out, hT, cT = pl.pallas_call(
        kernel,
        out_shape=(
            jax.ShapeDtypeStruct((B, O), jnp.float32),
            jax.ShapeDtypeStruct((n_layers, B, H), jnp.float32),
            jax.ShapeDtypeStruct((n_layers, B, H), jnp.float32),
        ),
        in_specs=[_VMEM_SPEC] * n_in,
        out_specs=(_VMEM_SPEC, _VMEM_SPEC, _VMEM_SPEC),
    )(x_flat, h0, c0, *weight_args, params["fc_w_t"], params["fc_b"])

    return out, (hT, cT)


# ----------------------------------------------------------------------------
# Pure-JAX reference (correctness oracle)
# ----------------------------------------------------------------------------
def _reference_forward(x, h0, c0, params, n_layers):
    B, T, _ = x.shape
    H = h0.shape[-1]
    layer_in = x
    h_list, c_list = [], []
    for l in range(n_layers):
        wih_t, whh_t, bias = params["lstm"][l]
        h, c = h0[l], c0[l]
        ys = []
        for t in range(T):
            g = layer_in[:, t, :] @ wih_t + bias + h @ whh_t
            i = jax.nn.sigmoid(g[:, :H])
            f = jax.nn.sigmoid(g[:, H:2 * H])
            gg = jnp.tanh(g[:, 2 * H:3 * H])
            o = jax.nn.sigmoid(g[:, 3 * H:])
            c = f * c + i * gg
            h = o * jnp.tanh(c)
            ys.append(h)
        layer_in = jnp.stack(ys, axis=1)
        h_list.append(h)
        c_list.append(c)
    out = jnp.maximum(h_list[-1], 0.0) @ params["fc_w_t"] + params["fc_b"]
    return out, (jnp.stack(h_list), jnp.stack(c_list))


# ----------------------------------------------------------------------------
# Deterministic parameter init (same shapes / init range as torch defaults)
# ----------------------------------------------------------------------------
def init_params(key, input_dim, hidden_dim, output_dim, n_layers):
    k = 1.0 / jnp.sqrt(hidden_dim)
    params = {"lstm": []}
    for l in range(n_layers):
        d_in = input_dim if l == 0 else hidden_dim
        key, k1, k2, k3, k4 = jax.random.split(key, 5)
        w_ih = jax.random.uniform(k1, (4 * hidden_dim, d_in),
                                  minval=-k, maxval=k, dtype=jnp.float32)
        w_hh = jax.random.uniform(k2, (4 * hidden_dim, hidden_dim),
                                  minval=-k, maxval=k, dtype=jnp.float32)
        b_ih = jax.random.uniform(k3, (4 * hidden_dim,),
                                  minval=-k, maxval=k, dtype=jnp.float32)
        b_hh = jax.random.uniform(k4, (4 * hidden_dim,),
                                  minval=-k, maxval=k, dtype=jnp.float32)
        # Transposed weights + combined bias (kernel-friendly layout).
        params["lstm"].append(
            (w_ih.T, w_hh.T, (b_ih + b_hh).reshape(1, 4 * hidden_dim)))
    key, k5, k6 = jax.random.split(key, 3)
    fc_w = jax.random.uniform(k5, (output_dim, hidden_dim),
                              minval=-k, maxval=k, dtype=jnp.float32)
    fc_b = jax.random.uniform(k6, (output_dim,),
                              minval=-k, maxval=k, dtype=jnp.float32)
    params["fc_w_t"] = fc_w.T
    params["fc_b"] = fc_b.reshape(1, output_dim)
    return params


if __name__ == "__main__":
    # Small shapes consistent with LSTMNet(input_dim, hidden_dim, output_dim, n_layers)
    B, T = 2, 8
    input_dim, hidden_dim, output_dim, n_layers = 4, 32, 4, 2

    key = jax.random.PRNGKey(0)
    key, kx = jax.random.split(key)
    x = jax.random.normal(kx, (B, T, input_dim), dtype=jnp.float32)

    # init_hidden equivalent: zeros of shape [n_layers, B, hidden_dim]
    h0 = jnp.zeros((n_layers, B, hidden_dim), dtype=jnp.float32)
    c0 = jnp.zeros((n_layers, B, hidden_dim), dtype=jnp.float32)

    params = init_params(key, input_dim, hidden_dim, output_dim, n_layers)

    out, (h_n, c_n) = lstm_net_forward(x, h0, c0, params, n_layers=n_layers)
    jax.block_until_ready((out, h_n, c_n))

    assert out.shape == (B, output_dim)
    assert h_n.shape == (n_layers, B, hidden_dim)
    assert c_n.shape == (n_layers, B, hidden_dim)

    # Correctness vs. pure-JAX reference
    ref_out, (ref_h, ref_c) = _reference_forward(x, h0, c0, params, n_layers)
    np.testing.assert_allclose(np.asarray(out), np.asarray(ref_out),
                               rtol=1e-4, atol=1e-4)
    np.testing.assert_allclose(np.asarray(h_n), np.asarray(ref_h),
                               rtol=1e-4, atol=1e-4)
    np.testing.assert_allclose(np.asarray(c_n), np.asarray(ref_c),
                               rtol=1e-4, atol=1e-4)

    print("KERNEL_OK")
</pallas_src>

<mosaic_0001>
module attributes {stable_mosaic.version = 11 : i64} {
  func.func @_lstm_net_kernel(%arg0: memref<16x4xf32, #tpu.memory_space<vmem>>, %arg1: memref<2x2x32xf32, #tpu.memory_space<vmem>>, %arg2: memref<2x2x32xf32, #tpu.memory_space<vmem>>, %arg3: memref<4x128xf32, #tpu.memory_space<vmem>>, %arg4: memref<32x128xf32, #tpu.memory_space<vmem>>, %arg5: memref<1x128xf32, #tpu.memory_space<vmem>>, %arg6: memref<32x128xf32, #tpu.memory_space<vmem>>, %arg7: memref<32x128xf32, #tpu.memory_space<vmem>>, %arg8: memref<1x128xf32, #tpu.memory_space<vmem>>, %arg9: memref<32x4xf32, #tpu.memory_space<vmem>>, %arg10: memref<1x4xf32, #tpu.memory_space<vmem>>, %arg11: memref<2x4xf32, #tpu.memory_space<vmem>>, %arg12: memref<2x2x32xf32, #tpu.memory_space<vmem>>, %arg13: memref<2x2x32xf32, #tpu.memory_space<vmem>>) attributes {dimension_semantics = [], scalar_prefetch = 0 : i64, scratch_operands = 0 : i64, tpu.core_type = #tpu.core_type<tc>} {
    %c0 = arith.constant 0 : index
    %c0_0 = arith.constant 0 : index
    %0 = vector.load %arg0[%c0, %c0_0] : memref<16x4xf32, #tpu.memory_space<vmem>>, vector<16x4xf32>
    %c0_1 = arith.constant 0 : index
    %c0_2 = arith.constant 0 : index
    %1 = vector.load %arg3[%c0_1, %c0_2] : memref<4x128xf32, #tpu.memory_space<vmem>>, vector<4x128xf32>
    %c0_3 = arith.constant 0 : index
    %c0_4 = arith.constant 0 : index
    %2 = vector.load %arg4[%c0_3, %c0_4] : memref<32x128xf32, #tpu.memory_space<vmem>>, vector<32x128xf32>
    %c0_5 = arith.constant 0 : index
    %c0_6 = arith.constant 0 : index
    %3 = vector.load %arg5[%c0_5, %c0_6] : memref<1x128xf32, #tpu.memory_space<vmem>>, vector<1x128xf32>
    %cst = arith.constant dense<0.000000e+00> : vector<16x128xf32>
    %4 = tpu.matmul %0, %1, %cst {dimension_numbers = #tpu.dot_dimension_numbers<[1], [0], [0], [1], [0, 0, 1, 1], [], []>} : vector<16x4xf32>, vector<4x128xf32>, vector<16x128xf32> -> vector<16x128xf32>
    %5 = vector.broadcast %3 : vector<1x128xf32> to vector<16x128xf32>
    %6 = arith.addf %4, %5 : vector<16x128xf32>
    %c0_7 = arith.constant 0 : index
    %c0_8 = arith.constant 0 : index
    %c0_9 = arith.constant 0 : index
    %7 = vector.load %arg1[%c0_7, %c0_8, %c0_9] : memref<2x2x32xf32, #tpu.memory_space<vmem>>, vector<1x2x32xf32>
    %8 = vector.shape_cast %7 : vector<1x2x32xf32> to vector<2x32xf32>
    %c0_10 = arith.constant 0 : index
    %c0_11 = arith.constant 0 : index
    %c0_12 = arith.constant 0 : index
    %9 = vector.load %arg2[%c0_10, %c0_11, %c0_12] : memref<2x2x32xf32, #tpu.memory_space<vmem>>, vector<1x2x32xf32>
    %10 = vector.shape_cast %9 : vector<1x2x32xf32> to vector<2x32xf32>
    %11 = vector.extract_strided_slice %6 {offsets = [0, 0], sizes = [2, 128], strides = [1, 1]} : vector<16x128xf32> to vector<2x128xf32>
    %cst_13 = arith.constant dense<0.000000e+00> : vector<2x128xf32>
    %12 = tpu.matmul %8, %2, %cst_13 {dimension_numbers = #tpu.dot_dimension_numbers<[1], [0], [0], [1], [0, 0, 1, 1], [], []>} : vector<2x32xf32>, vector<32x128xf32>, vector<2x128xf32> -> vector<2x128xf32>
    %13 = arith.addf %11, %12 : vector<2x128xf32>
    %14 = vector.extract_strided_slice %13 {offsets = [0, 0], sizes = [2, 32], strides = [1, 1]} : vector<2x128xf32> to vector<2x32xf32>
    %cst_14 = arith.constant 5.000000e-01 : f32
    %15 = vector.broadcast %cst_14 : f32 to vector<2x32xf32>
    %16 = arith.mulf %15, %14 : vector<2x32xf32>
    %17 = math.tanh %16 : vector<2x32xf32>
    %cst_15 = arith.constant 1.000000e+00 : f32
    %18 = vector.broadcast %cst_15 : f32 to vector<2x32xf32>
    %19 = arith.addf %17, %18 : vector<2x32xf32>
    %cst_16 = arith.constant 5.000000e-01 : f32
    %20 = vector.broadcast %cst_16 : f32 to vector<2x32xf32>
    %21 = arith.mulf %20, %19 : vector<2x32xf32>
    %22 = vector.extract_strided_slice %13 {offsets = [0, 32], sizes = [2, 32], strides = [1, 1]} : vector<2x128xf32> to vector<2x32xf32>
    %cst_17 = arith.constant 5.000000e-01 : f32
    %23 = vector.broadcast %cst_17 : f32 to vector<2x32xf32>
    %24 = arith.mulf %23, %22 : vector<2x32xf32>
    %25 = math.tanh %24 : vector<2x32xf32>
    %cst_18 = arith.constant 1.000000e+00 : f32
    %26 = vector.broadcast %cst_18 : f32 to vector<2x32xf32>
    %27 = arith.addf %25, %26 : vector<2x32xf32>
    %cst_19 = arith.constant 5.000000e-01 : f32
    %28 = vector.broadcast %cst_19 : f32 to vector<2x32xf32>
    %29 = arith.mulf %28, %27 : vector<2x32xf32>
    %30 = vector.extract_strided_slice %13 {offsets = [0, 64], sizes = [2, 32], strides = [1, 1]} : vector<2x128xf32> to vector<2x32xf32>
    %31 = math.tanh %30 : vector<2x32xf32>
    %32 = vector.extract_strided_slice %13 {offsets = [0, 96], sizes = [2, 32], strides = [1, 1]} : vector<2x128xf32> to vector<2x32xf32>
    %cst_20 = arith.constant 5.000000e-01 : f32
    %33 = vector.broadcast %cst_20 : f32 to vector<2x32xf32>
    %34 = arith.mulf %33, %32 : vector<2x32xf32>
    %35 = math.tanh %34 : vector<2x32xf32>
    %cst_21 = arith.constant 1.000000e+00 : f32
    %36 = vector.broadcast %cst_21 : f32 to vector<2x32xf32>
    %37 = arith.addf %35, %36 : vector<2x32xf32>
    %cst_22 = arith.constant 5.000000e-01 : f32
    %38 = vector.broadcast %cst_22 : f32 to vector<2x32xf32>
    %39 = arith.mulf %38, %37 : vector<2x32xf32>
    %40 = arith.mulf %29, %10 : vector<2x32xf32>
    %41 = arith.mulf %21, %31 : vector<2x32xf32>
    %42 = arith.addf %40, %41 : vector<2x32xf32>
    %43 = math.tanh %42 : vector<2x32xf32>
    %44 = arith.mulf %39, %43 : vector<2x32xf32>
    %45 = vector.extract_strided_slice %6 {offsets = [2, 0], sizes = [2, 128], strides = [1, 1]} : vector<16x128xf32> to vector<2x128xf32>
    %cst_23 = arith.constant dense<0.000000e+00> : vector<2x128xf32>
    %46 = tpu.matmul %44, %2, %cst_23 {dimension_numbers = #tpu.dot_dimension_numbers<[1], [0], [0], [1], [0, 0, 1, 1], [], []>} : vector<2x32xf32>, vector<32x128xf32>, vector<2x128xf32> -> vector<2x128xf32>
    %47 = arith.addf %45, %46 : vector<2x128xf32>
    %48 = vector.extract_strided_slice %47 {offsets = [0, 0], sizes = [2, 32], strides = [1, 1]} : vector<2x128xf32> to vector<2x32xf32>
    %cst_24 = arith.constant 5.000000e-01 : f32
    %49 = vector.broadcast %cst_24 : f32 to vector<2x32xf32>
    %50 = arith.mulf %49, %48 : vector<2x32xf32>
    %51 = math.tanh %50 : vector<2x32xf32>
    %cst_25 = arith.constant 1.000000e+00 : f32
    %52 = vector.broadcast %cst_25 : f32 to vector<2x32xf32>
    %53 = arith.addf %51, %52 : vector<2x32xf32>
    %cst_26 = arith.constant 5.000000e-01 : f32
    %54 = vector.broadcast %cst_26 : f32 to vector<2x32xf32>
    %55 = arith.mulf %54, %53 : vector<2x32xf32>
    %56 = vector.extract_strided_slice %47 {offsets = [0, 32], sizes = [2, 32], strides = [1, 1]} : vector<2x128xf32> to vector<2x32xf32>
    %cst_27 = arith.constant 5.000000e-01 : f32
    %57 = vector.broadcast %cst_27 : f32 to vector<2x32xf32>
    %58 = arith.mulf %57, %56 : vector<2x32xf32>
    %59 = math.tanh %58 : vector<2x32xf32>
    %cst_28 = arith.constant 1.000000e+00 : f32
    %60 = vector.broadcast %cst_28 : f32 to vector<2x32xf32>
    %61 = arith.addf %59, %60 : vector<2x32xf32>
    %cst_29 = arith.constant 5.000000e-01 : f32
    %62 = vector.broadcast %cst_29 : f32 to vector<2x32xf32>
    %63 = arith.mulf %62, %61 : vector<2x32xf32>
    %64 = vector.extract_strided_slice %47 {offsets = [0, 64], sizes = [2, 32], strides = [1, 1]} : vector<2x128xf32> to vector<2x32xf32>
    %65 = math.tanh %64 : vector<2x32xf32>
    %66 = vector.extract_strided_slice %47 {offsets = [0, 96], sizes = [2, 32], strides = [1, 1]} : vector<2x128xf32> to vector<2x32xf32>
    %cst_30 = arith.constant 5.000000e-01 : f32
    %67 = vector.broadcast %cst_30 : f32 to vector<2x32xf32>
    %68 = arith.mulf %67, %66 : vector<2x32xf32>
    %69 = math.tanh %68 : vector<2x32xf32>
    %cst_31 = arith.constant 1.000000e+00 : f32
    %70 = vector.broadcast %cst_31 : f32 to vector<2x32xf32>
    %71 = arith.addf %69, %70 : vector<2x32xf32>
    %cst_32 = arith.constant 5.000000e-01 : f32
    %72 = vector.broadcast %cst_32 : f32 to vector<2x32xf32>
    %73 = arith.mulf %72, %71 : vector<2x32xf32>
    %74 = arith.mulf %63, %42 : vector<2x32xf32>
    %75 = arith.mulf %55, %65 : vector<2x32xf32>
    %76 = arith.addf %74, %75 : vector<2x32xf32>
    %77 = math.tanh %76 : vector<2x32xf32>
    %78 = arith.mulf %73, %77 : vector<2x32xf32>
    %79 = vector.extract_strided_slice %6 {offsets = [4, 0], sizes = [2, 128], strides = [1, 1]} : vector<16x128xf32> to vector<2x128xf32>
    %cst_33 = arith.constant dense<0.000000e+00> : vector<2x128xf32>
    %80 = tpu.matmul %78, %2, %cst_33 {dimension_numbers = #tpu.dot_dimension_numbers<[1], [0], [0], [1], [0, 0, 1, 1], [], []>} : vector<2x32xf32>, vector<32x128xf32>, vector<2x128xf32> -> vector<2x128xf32>
    %81 = arith.addf %79, %80 : vector<2x128xf32>
    %82 = vector.extract_strided_slice %81 {offsets = [0, 0], sizes = [2, 32], strides = [1, 1]} : vector<2x128xf32> to vector<2x32xf32>
    %cst_34 = arith.constant 5.000000e-01 : f32
    %83 = vector.broadcast %cst_34 : f32 to vector<2x32xf32>
    %84 = arith.mulf %83, %82 : vector<2x32xf32>
    %85 = math.tanh %84 : vector<2x32xf32>
    %cst_35 = arith.constant 1.000000e+00 : f32
    %86 = vector.broadcast %cst_35 : f32 to vector<2x32xf32>
    %87 = arith.addf %85, %86 : vector<2x32xf32>
    %cst_36 = arith.constant 5.000000e-01 : f32
    %88 = vector.broadcast %cst_36 : f32 to vector<2x32xf32>
    %89 = arith.mulf %88, %87 : vector<2x32xf32>
    %90 = vector.extract_strided_slice %81 {offsets = [0, 32], sizes = [2, 32], strides = [1, 1]} : vector<2x128xf32> to vector<2x32xf32>
    %cst_37 = arith.constant 5.000000e-01 : f32
    %91 = vector.broadcast %cst_37 : f32 to vector<2x32xf32>
    %92 = arith.mulf %91, %90 : vector<2x32xf32>
    %93 = math.tanh %92 : vector<2x32xf32>
    %cst_38 = arith.constant 1.000000e+00 : f32
    %94 = vector.broadcast %cst_38 : f32 to vector<2x32xf32>
    %95 = arith.addf %93, %94 : vector<2x32xf32>
    %cst_39 = arith.constant 5.000000e-01 : f32
    %96 = vector.broadcast %cst_39 : f32 to vector<2x32xf32>
    %97 = arith.mulf %96, %95 : vector<2x32xf32>
    %98 = vector.extract_strided_slice %81 {offsets = [0, 64], sizes = [2, 32], strides = [1, 1]} : vector<2x128xf32> to vector<2x32xf32>
    %99 = math.tanh %98 : vector<2x32xf32>
    %100 = vector.extract_strided_slice %81 {offsets = [0, 96], sizes = [2, 32], strides = [1, 1]} : vector<2x128xf32> to vector<2x32xf32>
    %cst_40 = arith.constant 5.000000e-01 : f32
    %101 = vector.broadcast %cst_40 : f32 to vector<2x32xf32>
    %102 = arith.mulf %101, %100 : vector<2x32xf32>
    %103 = math.tanh %102 : vector<2x32xf32>
    %cst_41 = arith.constant 1.000000e+00 : f32
    %104 = vector.broadcast %cst_41 : f32 to vector<2x32xf32>
    %105 = arith.addf %103, %104 : vector<2x32xf32>
    %cst_42 = arith.constant 5.000000e-01 : f32
    %106 = vector.broadcast %cst_42 : f32 to vector<2x32xf32>
    %107 = arith.mulf %106, %105 : vector<2x32xf32>
    %108 = arith.mulf %97, %76 : vector<2x32xf32>
    %109 = arith.mulf %89, %99 : vector<2x32xf32>
    %110 = arith.addf %108, %109 : vector<2x32xf32>
    %111 = math.tanh %110 : vector<2x32xf32>
    %112 = arith.mulf %107, %111 : vector<2x32xf32>
    %113 = vector.extract_strided_slice %6 {offsets = [6, 0], sizes = [2, 128], strides = [1, 1]} : vector<16x128xf32> to vector<2x128xf32>
    %cst_43 = arith.constant dense<0.000000e+00> : vector<2x128xf32>
    %114 = tpu.matmul %112, %2, %cst_43 {dimension_numbers = #tpu.dot_dimension_numbers<[1], [0], [0], [1], [0, 0, 1, 1], [], []>} : vector<2x32xf32>, vector<32x128xf32>, vector<2x128xf32> -> vector<2x128xf32>
    %115 = arith.addf %113, %114 : vector<2x128xf32>
    %116 = vector.extract_strided_slice %115 {offsets = [0, 0], sizes = [2, 32], strides = [1, 1]} : vector<2x128xf32> to vector<2x32xf32>
    %cst_44 = arith.constant 5.000000e-01 : f32
    %117 = vector.broadcast %cst_44 : f32 to vector<2x32xf32>
    %118 = arith.mulf %117, %116 : vector<2x32xf32>
    %119 = math.tanh %118 : vector<2x32xf32>
    %cst_45 = arith.constant 1.000000e+00 : f32
    %120 = vector.broadcast %cst_45 : f32 to vector<2x32xf32>
    %121 = arith.addf %119, %120 : vector<2x32xf32>
    %cst_46 = arith.constant 5.000000e-01 : f32
    %122 = vector.broadcast %cst_46 : f32 to vector<2x32xf32>
    %123 = arith.mulf %122, %121 : vector<2x32xf32>
    %124 = vector.extract_strided_slice %115 {offsets = [0, 32], sizes = [2, 32], strides = [1, 1]} : vector<2x128xf32> to vector<2x32xf32>
    %cst_47 = arith.constant 5.000000e-01 : f32
    %125 = vector.broadcast %cst_47 : f32 to vector<2x32xf32>
    %126 = arith.mulf %125, %124 : vector<2x32xf32>
    %127 = math.tanh %126 : vector<2x32xf32>
    %cst_48 = arith.constant 1.000000e+00 : f32
    %128 = vector.broadcast %cst_48 : f32 to vector<2x32xf32>
    %129 = arith.addf %127, %128 : vector<2x32xf32>
    %cst_49 = arith.constant 5.000000e-01 : f32
    %130 = vector.broadcast %cst_49 : f32 to vector<2x32xf32>
    %131 = arith.mulf %130, %129 : vector<2x32xf32>
    %132 = vector.extract_strided_slice %115 {offsets = [0, 64], sizes = [2, 32], strides = [1, 1]} : vector<2x128xf32> to vector<2x32xf32>
    %133 = math.tanh %132 : vector<2x32xf32>
    %134 = vector.extract_strided_slice %115 {offsets = [0, 96], sizes = [2, 32], strides = [1, 1]} : vector<2x128xf32> to vector<2x32xf32>
    %cst_50 = arith.constant 5.000000e-01 : f32
    %135 = vector.broadcast %cst_50 : f32 to vector<2x32xf32>
    %136 = arith.mulf %135, %134 : vector<2x32xf32>
    %137 = math.tanh %136 : vector<2x32xf32>
    %cst_51 = arith.constant 1.000000e+00 : f32
    %138 = vector.broadcast %cst_51 : f32 to vector<2x32xf32>
    %139 = arith.addf %137, %138 : vector<2x32xf32>
    %cst_52 = arith.constant 5.000000e-01 : f32
    %140 = vector.broadcast %cst_52 : f32 to vector<2x32xf32>
    %141 = arith.mulf %140, %139 : vector<2x32xf32>
    %142 = arith.mulf %131, %110 : vector<2x32xf32>
    %143 = arith.mulf %123, %133 : vector<2x32xf32>
    %144 = arith.addf %142, %143 : vector<2x32xf32>
    %145 = math.tanh %144 : vector<2x32xf32>
    %146 = arith.mulf %141, %145 : vector<2x32xf32>
    %147 = vector.extract_strided_slice %6 {offsets = [8, 0], sizes = [2, 128], strides = [1, 1]} : vector<16x128xf32> to vector<2x128xf32>
    %cst_53 = arith.constant dense<0.000000e+00> : vector<2x128xf32>
    %148 = tpu.matmul %146, %2, %cst_53 {dimension_numbers = #tpu.dot_dimension_numbers<[1], [0], [0], [1], [0, 0, 1, 1], [], []>} : vector<2x32xf32>, vector<32x128xf32>, vector<2x128xf32> -> vector<2x128xf32>
    %149 = arith.addf %147, %148 : vector<2x128xf32>
    %150 = vector.extract_strided_slice %149 {offsets = [0, 0], sizes = [2, 32], strides = [1, 1]} : vector<2x128xf32> to vector<2x32xf32>
    %cst_54 = arith.constant 5.000000e-01 : f32
    %151 = vector.broadcast %cst_54 : f32 to vector<2x32xf32>
    %152 = arith.mulf %151, %150 : vector<2x32xf32>
    %153 = math.tanh %152 : vector<2x32xf32>
    %cst_55 = arith.constant 1.000000e+00 : f32
    %154 = vector.broadcast %cst_55 : f32 to vector<2x32xf32>
    %155 = arith.addf %153, %154 : vector<2x32xf32>
    %cst_56 = arith.constant 5.000000e-01 : f32
    %156 = vector.broadcast %cst_56 : f32 to vector<2x32xf32>
    %157 = arith.mulf %156, %155 : vector<2x32xf32>
    %158 = vector.extract_strided_slice %149 {offsets = [0, 32], sizes = [2, 32], strides = [1, 1]} : vector<2x128xf32> to vector<2x32xf32>
    %cst_57 = arith.constant 5.000000e-01 : f32
    %159 = vector.broadcast %cst_57 : f32 to vector<2x32xf32>
    %160 = arith.mulf %159, %158 : vector<2x32xf32>
    %161 = math.tanh %160 : vector<2x32xf32>
    %cst_58 = arith.constant 1.000000e+00 : f32
    %162 = vector.broadcast %cst_58 : f32 to vector<2x32xf32>
    %163 = arith.addf %161, %162 : vector<2x32xf32>
    %cst_59 = arith.constant 5.000000e-01 : f32
    %164 = vector.broadcast %cst_59 : f32 to vector<2x32xf32>
    %165 = arith.mulf %164, %163 : vector<2x32xf32>
    %166 = vector.extract_strided_slice %149 {offsets = [0, 64], sizes = [2, 32], strides = [1, 1]} : vector<2x128xf32> to vector<2x32xf32>
    %167 = math.tanh %166 : vector<2x32xf32>
    %168 = vector.extract_strided_slice %149 {offsets = [0, 96], sizes = [2, 32], strides = [1, 1]} : vector<2x128xf32> to vector<2x32xf32>
    %cst_60 = arith.constant 5.000000e-01 : f32
    %169 = vector.broadcast %cst_60 : f32 to vector<2x32xf32>
    %170 = arith.mulf %169, %168 : vector<2x32xf32>
    %171 = math.tanh %170 : vector<2x32xf32>
    %cst_61 = arith.constant 1.000000e+00 : f32
    %172 = vector.broadcast %cst_61 : f32 to vector<2x32xf32>
    %173 = arith.addf %171, %172 : vector<2x32xf32>
    %cst_62 = arith.constant 5.000000e-01 : f32
    %174 = vector.broadcast %cst_62 : f32 to vector<2x32xf32>
    %175 = arith.mulf %174, %173 : vector<2x32xf32>
    %176 = arith.mulf %165, %144 : vector<2x32xf32>
    %177 = arith.mulf %157, %167 : vector<2x32xf32>
    %178 = arith.addf %176, %177 : vector<2x32xf32>
    %179 = math.tanh %178 : vector<2x32xf32>
    %180 = arith.mulf %175, %179 : vector<2x32xf32>
    %181 = vector.extract_strided_slice %6 {offsets = [10, 0], sizes = [2, 128], strides = [1, 1]} : vector<16x128xf32> to vector<2x128xf32>
    %cst_63 = arith.constant dense<0.000000e+00> : vector<2x128xf32>
    %182 = tpu.matmul %180, %2, %cst_63 {dimension_numbers = #tpu.dot_dimension_numbers<[1], [0], [0], [1], [0, 0, 1, 1], [], []>} : vector<2x32xf32>, vector<32x128xf32>, vector<2x128xf32> -> vector<2x128xf32>
    %183 = arith.addf %181, %182 : vector<2x128xf32>
    %184 = vector.extract_strided_slice %183 {offsets = [0, 0], sizes = [2, 32], strides = [1, 1]} : vector<2x128xf32> to vector<2x32xf32>
    %cst_64 = arith.constant 5.000000e-01 : f32
    %185 = vector.broadcast %cst_64 : f32 to vector<2x32xf32>
    %186 = arith.mulf %185, %184 : vector<2x32xf32>
    %187 = math.tanh %186 : vector<2x32xf32>
    %cst_65 = arith.constant 1.000000e+00 : f32
    %188 = vector.broadcast %cst_65 : f32 to vector<2x32xf32>
    %189 = arith.addf %187, %188 : vector<2x32xf32>
    %cst_66 = arith.constant 5.000000e-01 : f32
    %190 = vector.broadcast %cst_66 : f32 to vector<2x32xf32>
    %191 = arith.mulf %190, %189 : vector<2x32xf32>
    %192 = vector.extract_strided_slice %183 {offsets = [0, 32], sizes = [2, 32], strides = [1, 1]} : vector<2x128xf32> to vector<2x32xf32>
    %cst_67 = arith.constant 5.000000e-01 : f32
    %193 = vector.broadcast %cst_67 : f32 to vector<2x32xf32>
    %194 = arith.mulf %193, %192 : vector<2x32xf32>
    %195 = math.tanh %194 : vector<2x32xf32>
    %cst_68 = arith.constant 1.000000e+00 : f32
    %196 = vector.broadcast %cst_68 : f32 to vector<2x32xf32>
    %197 = arith.addf %195, %196 : vector<2x32xf32>
    %cst_69 = arith.constant 5.000000e-01 : f32
    %198 = vector.broadcast %cst_69 : f32 to vector<2x32xf32>
    %199 = arith.mulf %198, %197 : vector<2x32xf32>
    %200 = vector.extract_strided_slice %183 {offsets = [0, 64], sizes = [2, 32], strides = [1, 1]} : vector<2x128xf32> to vector<2x32xf32>
    %201 = math.tanh %200 : vector<2x32xf32>
    %202 = vector.extract_strided_slice %183 {offsets = [0, 96], sizes = [2, 32], strides = [1, 1]} : vector<2x128xf32> to vector<2x32xf32>
    %cst_70 = arith.constant 5.000000e-01 : f32
    %203 = vector.broadcast %cst_70 : f32 to vector<2x32xf32>
    %204 = arith.mulf %203, %202 : vector<2x32xf32>
    %205 = math.tanh %204 : vector<2x32xf32>
    %cst_71 = arith.constant 1.000000e+00 : f32
    %206 = vector.broadcast %cst_71 : f32 to vector<2x32xf32>
    %207 = arith.addf %205, %206 : vector<2x32xf32>
    %cst_72 = arith.constant 5.000000e-01 : f32
    %208 = vector.broadcast %cst_72 : f32 to vector<2x32xf32>
    %209 = arith.mulf %208, %207 : vector<2x32xf32>
    %210 = arith.mulf %199, %178 : vector<2x32xf32>
    %211 = arith.mulf %191, %201 : vector<2x32xf32>
    %212 = arith.addf %210, %211 : vector<2x32xf32>
    %213 = math.tanh %212 : vector<2x32xf32>
    %214 = arith.mulf %209, %213 : vector<2x32xf32>
    %215 = vector.extract_strided_slice %6 {offsets = [12, 0], sizes = [2, 128], strides = [1, 1]} : vector<16x128xf32> to vector<2x128xf32>
    %cst_73 = arith.constant dense<0.000000e+00> : vector<2x128xf32>
    %216 = tpu.matmul %214, %2, %cst_73 {dimension_numbers = #tpu.dot_dimension_numbers<[1], [0], [0], [1], [0, 0, 1, 1], [], []>} : vector<2x32xf32>, vector<32x128xf32>, vector<2x128xf32> -> vector<2x128xf32>
    %217 = arith.addf %215, %216 : vector<2x128xf32>
    %218 = vector.extract_strided_slice %217 {offsets = [0, 0], sizes = [2, 32], strides = [1, 1]} : vector<2x128xf32> to vector<2x32xf32>
    %cst_74 = arith.constant 5.000000e-01 : f32
    %219 = vector.broadcast %cst_74 : f32 to vector<2x32xf32>
    %220 = arith.mulf %219, %218 : vector<2x32xf32>
    %221 = math.tanh %220 : vector<2x32xf32>
    %cst_75 = arith.constant 1.000000e+00 : f32
    %222 = vector.broadcast %cst_75 : f32 to vector<2x32xf32>
    %223 = arith.addf %221, %222 : vector<2x32xf32>
    %cst_76 = arith.constant 5.000000e-01 : f32
    %224 = vector.broadcast %cst_76 : f32 to vector<2x32xf32>
    %225 = arith.mulf %224, %223 : vector<2x32xf32>
    %226 = vector.extract_strided_slice %217 {offsets = [0, 32], sizes = [2, 32], strides = [1, 1]} : vector<2x128xf32> to vector<2x32xf32>
    %cst_77 = arith.constant 5.000000e-01 : f32
    %227 = vector.broadcast %cst_77 : f32 to vector<2x32xf32>
    %228 = arith.mulf %227, %226 : vector<2x32xf32>
    %229 = math.tanh %228 : vector<2x32xf32>
    %cst_78 = arith.constant 1.000000e+00 : f32
    %230 = vector.broadcast %cst_78 : f32 to vector<2x32xf32>
    %231 = arith.addf %229, %230 : vector<2x32xf32>
    %cst_79 = arith.constant 5.000000e-01 : f32
    %232 = vector.broadcast %cst_79 : f32 to vector<2x32xf32>
    %233 = arith.mulf %232, %231 : vector<2x32xf32>
    %234 = vector.extract_strided_slice %217 {offsets = [0, 64], sizes = [2, 32], strides = [1, 1]} : vector<2x128xf32> to vector<2x32xf32>
    %235 = math.tanh %234 : vector<2x32xf32>
    %236 = vector.extract_strided_slice %217 {offsets = [0, 96], sizes = [2, 32], strides = [1, 1]} : vector<2x128xf32> to vector<2x32xf32>
    %cst_80 = arith.constant 5.000000e-01 : f32
    %237 = vector.broadcast %cst_80 : f32 to vector<2x32xf32>
    %238 = arith.mulf %237, %236 : vector<2x32xf32>
    %239 = math.tanh %238 : vector<2x32xf32>
    %cst_81 = arith.constant 1.000000e+00 : f32
    %240 = vector.broadcast %cst_81 : f32 to vector<2x32xf32>
    %241 = arith.addf %239, %240 : vector<2x32xf32>
    %cst_82 = arith.constant 5.000000e-01 : f32
    %242 = vector.broadcast %cst_82 : f32 to vector<2x32xf32>
    %243 = arith.mulf %242, %241 : vector<2x32xf32>
    %244 = arith.mulf %233, %212 : vector<2x32xf32>
    %245 = arith.mulf %225, %235 : vector<2x32xf32>
    %246 = arith.addf %244, %245 : vector<2x32xf32>
    %247 = math.tanh %246 : vector<2x32xf32>
    %248 = arith.mulf %243, %247 : vector<2x32xf32>
    %249 = vector.extract_strided_slice %6 {offsets = [14, 0], sizes = [2, 128], strides = [1, 1]} : vector<16x128xf32> to vector<2x128xf32>
    %cst_83 = arith.constant dense<0.000000e+00> : vector<2x128xf32>
    %250 = tpu.matmul %248, %2, %cst_83 {dimension_numbers = #tpu.dot_dimension_numbers<[1], [0], [0], [1], [0, 0, 1, 1], [], []>} : vector<2x32xf32>, vector<32x128xf32>, vector<2x128xf32> -> vector<2x128xf32>
    %251 = arith.addf %249, %250 : vector<2x128xf32>
    %252 = vector.extract_strided_slice %251 {offsets = [0, 0], sizes = [2, 32], strides = [1, 1]} : vector<2x128xf32> to vector<2x32xf32>
    %cst_84 = arith.constant 5.000000e-01 : f32
    %253 = vector.broadcast %cst_84 : f32 to vector<2x32xf32>
    %254 = arith.mulf %253, %252 : vector<2x32xf32>
    %255 = math.tanh %254 : vector<2x32xf32>
    %cst_85 = arith.constant 1.000000e+00 : f32
    %256 = vector.broadcast %cst_85 : f32 to vector<2x32xf32>
    %257 = arith.addf %255, %256 : vector<2x32xf32>
    %cst_86 = arith.constant 5.000000e-01 : f32
    %258 = vector.broadcast %cst_86 : f32 to vector<2x32xf32>
    %259 = arith.mulf %258, %257 : vector<2x32xf32>
    %260 = vector.extract_strided_slice %251 {offsets = [0, 32], sizes = [2, 32], strides = [1, 1]} : vector<2x128xf32> to vector<2x32xf32>
    %cst_87 = arith.constant 5.000000e-01 : f32
    %261 = vector.broadcast %cst_87 : f32 to vector<2x32xf32>
    %262 = arith.mulf %261, %260 : vector<2x32xf32>
    %263 = math.tanh %262 : vector<2x32xf32>
    %cst_88 = arith.constant 1.000000e+00 : f32
    %264 = vector.broadcast %cst_88 : f32 to vector<2x32xf32>
    %265 = arith.addf %263, %264 : vector<2x32xf32>
    %cst_89 = arith.constant 5.000000e-01 : f32
    %266 = vector.broadcast %cst_89 : f32 to vector<2x32xf32>
    %267 = arith.mulf %266, %265 : vector<2x32xf32>
    %268 = vector.extract_strided_slice %251 {offsets = [0, 64], sizes = [2, 32], strides = [1, 1]} : vector<2x128xf32> to vector<2x32xf32>
    %269 = math.tanh %268 : vector<2x32xf32>
    %270 = vector.extract_strided_slice %251 {offsets = [0, 96], sizes = [2, 32], strides = [1, 1]} : vector<2x128xf32> to vector<2x32xf32>
    %cst_90 = arith.constant 5.000000e-01 : f32
    %271 = vector.broadcast %cst_90 : f32 to vector<2x32xf32>
    %272 = arith.mulf %271, %270 : vector<2x32xf32>
    %273 = math.tanh %272 : vector<2x32xf32>
    %cst_91 = arith.constant 1.000000e+00 : f32
    %274 = vector.broadcast %cst_91 : f32 to vector<2x32xf32>
    %275 = arith.addf %273, %274 : vector<2x32xf32>
    %cst_92 = arith.constant 5.000000e-01 : f32
    %276 = vector.broadcast %cst_92 : f32 to vector<2x32xf32>
    %277 = arith.mulf %276, %275 : vector<2x32xf32>
    %278 = arith.mulf %267, %246 : vector<2x32xf32>
    %279 = arith.mulf %259, %269 : vector<2x32xf32>
    %280 = arith.addf %278, %279 : vector<2x32xf32>
    %281 = math.tanh %280 : vector<2x32xf32>
    %282 = arith.mulf %277, %281 : vector<2x32xf32>
    %c0_93 = arith.constant 0 : index
    %c0_94 = arith.constant 0 : index
    %c0_95 = arith.constant 0 : index
    %283 = vector.load %arg12[%c0_93, %c0_94, %c0_95] : memref<2x2x32xf32, #tpu.memory_space<vmem>>, vector<1x2x32xf32>
    %284 = vector.shape_cast %283 : vector<1x2x32xf32> to vector<2x32xf32>
    %285 = vector.shape_cast %282 : vector<2x32xf32> to vector<1x2x32xf32>
    tpu.vector_store %arg12[%c0_93, %c0_94, %c0_95], %285 {strides = array<i32>} : memref<2x2x32xf32, #tpu.memory_space<vmem>>, vector<1x2x32xf32>,
    %c0_96 = arith.constant 0 : index
    %c0_97 = arith.constant 0 : index
    %c0_98 = arith.constant 0 : index
    %286 = vector.load %arg13[%c0_96, %c0_97, %c0_98] : memref<2x2x32xf32, #tpu.memory_space<vmem>>, vector<1x2x32xf32>
    %287 = vector.shape_cast %286 : vector<1x2x32xf32> to vector<2x32xf32>
    %288 = vector.shape_cast %280 : vector<2x32xf32> to vector<1x2x32xf32>
    tpu.vector_store %arg13[%c0_96, %c0_97, %c0_98], %288 {strides = array<i32>} : memref<2x2x32xf32, #tpu.memory_space<vmem>>, vector<1x2x32xf32>,
    %289 = tpu.concatenate %44, %78, %112, %146, %180, %214, %248, %282 in 0 : vector<2x32xf32>, vector<2x32xf32>, vector<2x32xf32>, vector<2x32xf32>, vector<2x32xf32>, vector<2x32xf32>, vector<2x32xf32>, vector<2x32xf32> -> vector<16x32xf32>
    %c0_99 = arith.constant 0 : index
    %c0_100 = arith.constant 0 : index
    %290 = vector.load %arg6[%c0_99, %c0_100] : memref<32x128xf32, #tpu.memory_space<vmem>>, vector<32x128xf32>
    %c0_101 = arith.constant 0 : index
    %c0_102 = arith.constant 0 : index
    %291 = vector.load %arg7[%c0_101, %c0_102] : memref<32x128xf32, #tpu.memory_space<vmem>>, vector<32x128xf32>
    %c0_103 = arith.constant 0 : index
    %c0_104 = arith.constant 0 : index
    %292 = vector.load %arg8[%c0_103, %c0_104] : memref<1x128xf32, #tpu.memory_space<vmem>>, vector<1x128xf32>
    %cst_105 = arith.constant dense<0.000000e+00> : vector<16x128xf32>
    %293 = tpu.matmul %289, %290, %cst_105 {dimension_numbers = #tpu.dot_dimension_numbers<[1], [0], [0], [1], [0, 0, 1, 1], [], []>} : vector<16x32xf32>, vector<32x128xf32>, vector<16x128xf32> -> vector<16x128xf32>
    %294 = vector.broadcast %292 : vector<1x128xf32> to vector<16x128xf32>
    %295 = arith.addf %293, %294 : vector<16x128xf32>
    %c1 = arith.constant 1 : index
    %c0_106 = arith.constant 0 : index
    %c0_107 = arith.constant 0 : index
    %296 = vector.load %arg1[%c1, %c0_106, %c0_107] : memref<2x2x32xf32, #tpu.memory_space<vmem>>, vector<1x2x32xf32>
    %297 = vector.shape_cast %296 : vector<1x2x32xf32> to vector<2x32xf32>
    %c1_108 = arith.constant 1 : index
    %c0_109 = arith.constant 0 : index
    %c0_110 = arith.constant 0 : index
    %298 = vector.load %arg2[%c1_108, %c0_109, %c0_110] : memref<2x2x32xf32, #tpu.memory_space<vmem>>, vector<1x2x32xf32>
    %299 = vector.shape_cast %298 : vector<1x2x32xf32> to vector<2x32xf32>
    %300 = vector.extract_strided_slice %295 {offsets = [0, 0], sizes = [2, 128], strides = [1, 1]} : vector<16x128xf32> to vector<2x128xf32>
    %cst_111 = arith.constant dense<0.000000e+00> : vector<2x128xf32>
    %301 = tpu.matmul %297, %291, %cst_111 {dimension_numbers = #tpu.dot_dimension_numbers<[1], [0], [0], [1], [0, 0, 1, 1], [], []>} : vector<2x32xf32>, vector<32x128xf32>, vector<2x128xf32> -> vector<2x128xf32>
    %302 = arith.addf %300, %301 : vector<2x128xf32>
    %303 = vector.extract_strided_slice %302 {offsets = [0, 0], sizes = [2, 32], strides = [1, 1]} : vector<2x128xf32> to vector<2x32xf32>
    %cst_112 = arith.constant 5.000000e-01 : f32
    %304 = vector.broadcast %cst_112 : f32 to vector<2x32xf32>
    %305 = arith.mulf %304, %303 : vector<2x32xf32>
    %306 = math.tanh %305 : vector<2x32xf32>
    %cst_113 = arith.constant 1.000000e+00 : f32
    %307 = vector.broadcast %cst_113 : f32 to vector<2x32xf32>
    %308 = arith.addf %306, %307 : vector<2x32xf32>
    %cst_114 = arith.constant 5.000000e-01 : f32
    %309 = vector.broadcast %cst_114 : f32 to vector<2x32xf32>
    %310 = arith.mulf %309, %308 : vector<2x32xf32>
    %311 = vector.extract_strided_slice %302 {offsets = [0, 32], sizes = [2, 32], strides = [1, 1]} : vector<2x128xf32> to vector<2x32xf32>
    %cst_115 = arith.constant 5.000000e-01 : f32
    %312 = vector.broadcast %cst_115 : f32 to vector<2x32xf32>
    %313 = arith.mulf %312, %311 : vector<2x32xf32>
    %314 = math.tanh %313 : vector<2x32xf32>
    %cst_116 = arith.constant 1.000000e+00 : f32
    %315 = vector.broadcast %cst_116 : f32 to vector<2x32xf32>
    %316 = arith.addf %314, %315 : vector<2x32xf32>
    %cst_117 = arith.constant 5.000000e-01 : f32
    %317 = vector.broadcast %cst_117 : f32 to vector<2x32xf32>
    %318 = arith.mulf %317, %316 : vector<2x32xf32>
    %319 = vector.extract_strided_slice %302 {offsets = [0, 64], sizes = [2, 32], strides = [1, 1]} : vector<2x128xf32> to vector<2x32xf32>
    %320 = math.tanh %319 : vector<2x32xf32>
    %321 = vector.extract_strided_slice %302 {offsets = [0, 96], sizes = [2, 32], strides = [1, 1]} : vector<2x128xf32> to vector<2x32xf32>
    %cst_118 = arith.constant 5.000000e-01 : f32
    %322 = vector.broadcast %cst_118 : f32 to vector<2x32xf32>
    %323 = arith.mulf %322, %321 : vector<2x32xf32>
    %324 = math.tanh %323 : vector<2x32xf32>
    %cst_119 = arith.constant 1.000000e+00 : f32
    %325 = vector.broadcast %cst_119 : f32 to vector<2x32xf32>
    %326 = arith.addf %324, %325 : vector<2x32xf32>
    %cst_120 = arith.constant 5.000000e-01 : f32
    %327 = vector.broadcast %cst_120 : f32 to vector<2x32xf32>
    %328 = arith.mulf %327, %326 : vector<2x32xf32>
    %329 = arith.mulf %318, %299 : vector<2x32xf32>
    %330 = arith.mulf %310, %320 : vector<2x32xf32>
    %331 = arith.addf %329, %330 : vector<2x32xf32>
    %332 = math.tanh %331 : vector<2x32xf32>
    %333 = arith.mulf %328, %332 : vector<2x32xf32>
    %334 = vector.extract_strided_slice %295 {offsets = [2, 0], sizes = [2, 128], strides = [1, 1]} : vector<16x128xf32> to vector<2x128xf32>
    %cst_121 = arith.constant dense<0.000000e+00> : vector<2x128xf32>
    %335 = tpu.matmul %333, %291, %cst_121 {dimension_numbers = #tpu.dot_dimension_numbers<[1], [0], [0], [1], [0, 0, 1, 1], [], []>} : vector<2x32xf32>, vector<32x128xf32>, vector<2x128xf32> -> vector<2x128xf32>
    %336 = arith.addf %334, %335 : vector<2x128xf32>
    %337 = vector.extract_strided_slice %336 {offsets = [0, 0], sizes = [2, 32], strides = [1, 1]} : vector<2x128xf32> to vector<2x32xf32>
    %cst_122 = arith.constant 5.000000e-01 : f32
    %338 = vector.broadcast %cst_122 : f32 to vector<2x32xf32>
    %339 = arith.mulf %338, %337 : vector<2x32xf32>
    %340 = math.tanh %339 : vector<2x32xf32>
    %cst_123 = arith.constant 1.000000e+00 : f32
    %341 = vector.broadcast %cst_123 : f32 to vector<2x32xf32>
    %342 = arith.addf %340, %341 : vector<2x32xf32>
    %cst_124 = arith.constant 5.000000e-01 : f32
    %343 = vector.broadcast %cst_124 : f32 to vector<2x32xf32>
    %344 = arith.mulf %343, %342 : vector<2x32xf32>
    %345 = vector.extract_strided_slice %336 {offsets = [0, 32], sizes = [2, 32], strides = [1, 1]} : vector<2x128xf32> to vector<2x32xf32>
    %cst_125 = arith.constant 5.000000e-01 : f32
    %346 = vector.broadcast %cst_125 : f32 to vector<2x32xf32>
    %347 = arith.mulf %346, %345 : vector<2x32xf32>
    %348 = math.tanh %347 : vector<2x32xf32>
    %cst_126 = arith.constant 1.000000e+00 : f32
    %349 = vector.broadcast %cst_126 : f32 to vector<2x32xf32>
    %350 = arith.addf %348, %349 : vector<2x32xf32>
    %cst_127 = arith.constant 5.000000e-01 : f32
    %351 = vector.broadcast %cst_127 : f32 to vector<2x32xf32>
    %352 = arith.mulf %351, %350 : vector<2x32xf32>
    %353 = vector.extract_strided_slice %336 {offsets = [0, 64], sizes = [2, 32], strides = [1, 1]} : vector<2x128xf32> to vector<2x32xf32>
    %354 = math.tanh %353 : vector<2x32xf32>
    %355 = vector.extract_strided_slice %336 {offsets = [0, 96], sizes = [2, 32], strides = [1, 1]} : vector<2x128xf32> to vector<2x32xf32>
    %cst_128 = arith.constant 5.000000e-01 : f32
    %356 = vector.broadcast %cst_128 : f32 to vector<2x32xf32>
    %357 = arith.mulf %356, %355 : vector<2x32xf32>
    %358 = math.tanh %357 : vector<2x32xf32>
    %cst_129 = arith.constant 1.000000e+00 : f32
    %359 = vector.broadcast %cst_129 : f32 to vector<2x32xf32>
    %360 = arith.addf %358, %359 : vector<2x32xf32>
    %cst_130 = arith.constant 5.000000e-01 : f32
    %361 = vector.broadcast %cst_130 : f32 to vector<2x32xf32>
    %362 = arith.mulf %361, %360 : vector<2x32xf32>
    %363 = arith.mulf %352, %331 : vector<2x32xf32>
    %364 = arith.mulf %344, %354 : vector<2x32xf32>
    %365 = arith.addf %363, %364 : vector<2x32xf32>
    %366 = math.tanh %365 : vector<2x32xf32>
    %367 = arith.mulf %362, %366 : vector<2x32xf32>
    %368 = vector.extract_strided_slice %295 {offsets = [4, 0], sizes = [2, 128], strides = [1, 1]} : vector<16x128xf32> to vector<2x128xf32>
    %cst_131 = arith.constant dense<0.000000e+00> : vector<2x128xf32>
    %369 = tpu.matmul %367, %291, %cst_131 {dimension_numbers = #tpu.dot_dimension_numbers<[1], [0], [0], [1], [0, 0, 1, 1], [], []>} : vector<2x32xf32>, vector<32x128xf32>, vector<2x128xf32> -> vector<2x128xf32>
    %370 = arith.addf %368, %369 : vector<2x128xf32>
    %371 = vector.extract_strided_slice %370 {offsets = [0, 0], sizes = [2, 32], strides = [1, 1]} : vector<2x128xf32> to vector<2x32xf32>
    %cst_132 = arith.constant 5.000000e-01 : f32
    %372 = vector.broadcast %cst_132 : f32 to vector<2x32xf32>
    %373 = arith.mulf %372, %371 : vector<2x32xf32>
    %374 = math.tanh %373 : vector<2x32xf32>
    %cst_133 = arith.constant 1.000000e+00 : f32
    %375 = vector.broadcast %cst_133 : f32 to vector<2x32xf32>
    %376 = arith.addf %374, %375 : vector<2x32xf32>
    %cst_134 = arith.constant 5.000000e-01 : f32
    %377 = vector.broadcast %cst_134 : f32 to vector<2x32xf32>
    %378 = arith.mulf %377, %376 : vector<2x32xf32>
    %379 = vector.extract_strided_slice %370 {offsets = [0, 32], sizes = [2, 32], strides = [1, 1]} : vector<2x128xf32> to vector<2x32xf32>
    %cst_135 = arith.constant 5.000000e-01 : f32
    %380 = vector.broadcast %cst_135 : f32 to vector<2x32xf32>
    %381 = arith.mulf %380, %379 : vector<2x32xf32>
    %382 = math.tanh %381 : vector<2x32xf32>
    %cst_136 = arith.constant 1.000000e+00 : f32
    %383 = vector.broadcast %cst_136 : f32 to vector<2x32xf32>
    %384 = arith.addf %382, %383 : vector<2x32xf32>
    %cst_137 = arith.constant 5.000000e-01 : f32
    %385 = vector.broadcast %cst_137 : f32 to vector<2x32xf32>
    %386 = arith.mulf %385, %384 : vector<2x32xf32>
    %387 = vector.extract_strided_slice %370 {offsets = [0, 64], sizes = [2, 32], strides = [1, 1]} : vector<2x128xf32> to vector<2x32xf32>
    %388 = math.tanh %387 : vector<2x32xf32>
    %389 = vector.extract_strided_slice %370 {offsets = [0, 96], sizes = [2, 32], strides = [1, 1]} : vector<2x128xf32> to vector<2x32xf32>
    %cst_138 = arith.constant 5.000000e-01 : f32
    %390 = vector.broadcast %cst_138 : f32 to vector<2x32xf32>
    %391 = arith.mulf %390, %389 : vector<2x32xf32>
    %392 = math.tanh %391 : vector<2x32xf32>
    %cst_139 = arith.constant 1.000000e+00 : f32
    %393 = vector.broadcast %cst_139 : f32 to vector<2x32xf32>
    %394 = arith.addf %392, %393 : vector<2x32xf32>
    %cst_140 = arith.constant 5.000000e-01 : f32
    %395 = vector.broadcast %cst_140 : f32 to vector<2x32xf32>
    %396 = arith.mulf %395, %394 : vector<2x32xf32>
    %397 = arith.mulf %386, %365 : vector<2x32xf32>
    %398 = arith.mulf %378, %388 : vector<2x32xf32>
    %399 = arith.addf %397, %398 : vector<2x32xf32>
    %400 = math.tanh %399 : vector<2x32xf32>
    %401 = arith.mulf %396, %400 : vector<2x32xf32>
    %402 = vector.extract_strided_slice %295 {offsets = [6, 0], sizes = [2, 128], strides = [1, 1]} : vector<16x128xf32> to vector<2x128xf32>
    %cst_141 = arith.constant dense<0.000000e+00> : vector<2x128xf32>
    %403 = tpu.matmul %401, %291, %cst_141 {dimension_numbers = #tpu.dot_dimension_numbers<[1], [0], [0], [1], [0, 0, 1, 1], [], []>} : vector<2x32xf32>, vector<32x128xf32>, vector<2x128xf32> -> vector<2x128xf32>
    %404 = arith.addf %402, %403 : vector<2x128xf32>
    %405 = vector.extract_strided_slice %404 {offsets = [0, 0], sizes = [2, 32], strides = [1, 1]} : vector<2x128xf32> to vector<2x32xf32>
    %cst_142 = arith.constant 5.000000e-01 : f32
    %406 = vector.broadcast %cst_142 : f32 to vector<2x32xf32>
    %407 = arith.mulf %406, %405 : vector<2x32xf32>
    %408 = math.tanh %407 : vector<2x32xf32>
    %cst_143 = arith.constant 1.000000e+00 : f32
    %409 = vector.broadcast %cst_143 : f32 to vector<2x32xf32>
    %410 = arith.addf %408, %409 : vector<2x32xf32>
    %cst_144 = arith.constant 5.000000e-01 : f32
    %411 = vector.broadcast %cst_144 : f32 to vector<2x32xf32>
    %412 = arith.mulf %411, %410 : vector<2x32xf32>
    %413 = vector.extract_strided_slice %404 {offsets = [0, 32], sizes = [2, 32], strides = [1, 1]} : vector<2x128xf32> to vector<2x32xf32>
    %cst_145 = arith.constant 5.000000e-01 : f32
    %414 = vector.broadcast %cst_145 : f32 to vector<2x32xf32>
    %415 = arith.mulf %414, %413 : vector<2x32xf32>
    %416 = math.tanh %415 : vector<2x32xf32>
    %cst_146 = arith.constant 1.000000e+00 : f32
    %417 = vector.broadcast %cst_146 : f32 to vector<2x32xf32>
    %418 = arith.addf %416, %417 : vector<2x32xf32>
    %cst_147 = arith.constant 5.000000e-01 : f32
    %419 = vector.broadcast %cst_147 : f32 to vector<2x32xf32>
    %420 = arith.mulf %419, %418 : vector<2x32xf32>
    %421 = vector.extract_strided_slice %404 {offsets = [0, 64], sizes = [2, 32], strides = [1, 1]} : vector<2x128xf32> to vector<2x32xf32>
    %422 = math.tanh %421 : vector<2x32xf32>
    %423 = vector.extract_strided_slice %404 {offsets = [0, 96], sizes = [2, 32], strides = [1, 1]} : vector<2x128xf32> to vector<2x32xf32>
    %cst_148 = arith.constant 5.000000e-01 : f32
    %424 = vector.broadcast %cst_148 : f32 to vector<2x32xf32>
    %425 = arith.mulf %424, %423 : vector<2x32xf32>
    %426 = math.tanh %425 : vector<2x32xf32>
    %cst_149 = arith.constant 1.000000e+00 : f32
    %427 = vector.broadcast %cst_149 : f32 to vector<2x32xf32>
    %428 = arith.addf %426, %427 : vector<2x32xf32>
    %cst_150 = arith.constant 5.000000e-01 : f32
    %429 = vector.broadcast %cst_150 : f32 to vector<2x32xf32>
    %430 = arith.mulf %429, %428 : vector<2x32xf32>
    %431 = arith.mulf %420, %399 : vector<2x32xf32>
    %432 = arith.mulf %412, %422 : vector<2x32xf32>
    %433 = arith.addf %431, %432 : vector<2x32xf32>
    %434 = math.tanh %433 : vector<2x32xf32>
    %435 = arith.mulf %430, %434 : vector<2x32xf32>
    %436 = vector.extract_strided_slice %295 {offsets = [8, 0], sizes = [2, 128], strides = [1, 1]} : vector<16x128xf32> to vector<2x128xf32>
    %cst_151 = arith.constant dense<0.000000e+00> : vector<2x128xf32>
    %437 = tpu.matmul %435, %291, %cst_151 {dimension_numbers = #tpu.dot_dimension_numbers<[1], [0], [0], [1], [0, 0, 1, 1], [], []>} : vector<2x32xf32>, vector<32x128xf32>, vector<2x128xf32> -> vector<2x128xf32>
    %438 = arith.addf %436, %437 : vector<2x128xf32>
    %439 = vector.extract_strided_slice %438 {offsets = [0, 0], sizes = [2, 32], strides = [1, 1]} : vector<2x128xf32> to vector<2x32xf32>
    %cst_152 = arith.constant 5.000000e-01 : f32
    %440 = vector.broadcast %cst_152 : f32 to vector<2x32xf32>
    %441 = arith.mulf %440, %439 : vector<2x32xf32>
    %442 = math.tanh %441 : vector<2x32xf32>
    %cst_153 = arith.constant 1.000000e+00 : f32
    %443 = vector.broadcast %cst_153 : f32 to vector<2x32xf32>
    %444 = arith.addf %442, %443 : vector<2x32xf32>
    %cst_154 = arith.constant 5.000000e-01 : f32
    %445 = vector.broadcast %cst_154 : f32 to vector<2x32xf32>
    %446 = arith.mulf %445, %444 : vector<2x32xf32>
    %447 = vector.extract_strided_slice %438 {offsets = [0, 32], sizes = [2, 32], strides = [1, 1]} : vector<2x128xf32> to vector<2x32xf32>
    %cst_155 = arith.constant 5.000000e-01 : f32
    %448 = vector.broadcast %cst_155 : f32 to vector<2x32xf32>
    %449 = arith.mulf %448, %447 : vector<2x32xf32>
    %450 = math.tanh %449 : vector<2x32xf32>
    %cst_156 = arith.constant 1.000000e+00 : f32
    %451 = vector.broadcast %cst_156 : f32 to vector<2x32xf32>
    %452 = arith.addf %450, %451 : vector<2x32xf32>
    %cst_157 = arith.constant 5.000000e-01 : f32
    %453 = vector.broadcast %cst_157 : f32 to vector<2x32xf32>
    %454 = arith.mulf %453, %452 : vector<2x32xf32>
    %455 = vector.extract_strided_slice %438 {offsets = [0, 64], sizes = [2, 32], strides = [1, 1]} : vector<2x128xf32> to vector<2x32xf32>
    %456 = math.tanh %455 : vector<2x32xf32>
    %457 = vector.extract_strided_slice %438 {offsets = [0, 96], sizes = [2, 32], strides = [1, 1]} : vector<2x128xf32> to vector<2x32xf32>
    %cst_158 = arith.constant 5.000000e-01 : f32
    %458 = vector.broadcast %cst_158 : f32 to vector<2x32xf32>
    %459 = arith.mulf %458, %457 : vector<2x32xf32>
    %460 = math.tanh %459 : vector<2x32xf32>
    %cst_159 = arith.constant 1.000000e+00 : f32
    %461 = vector.broadcast %cst_159 : f32 to vector<2x32xf32>
    %462 = arith.addf %460, %461 : vector<2x32xf32>
    %cst_160 = arith.constant 5.000000e-01 : f32
    %463 = vector.broadcast %cst_160 : f32 to vector<2x32xf32>
    %464 = arith.mulf %463, %462 : vector<2x32xf32>
    %465 = arith.mulf %454, %433 : vector<2x32xf32>
    %466 = arith.mulf %446, %456 : vector<2x32xf32>
    %467 = arith.addf %465, %466 : vector<2x32xf32>
    %468 = math.tanh %467 : vector<2x32xf32>
    %469 = arith.mulf %464, %468 : vector<2x32xf32>
    %470 = vector.extract_strided_slice %295 {offsets = [10, 0], sizes = [2, 128], strides = [1, 1]} : vector<16x128xf32> to vector<2x128xf32>
    %cst_161 = arith.constant dense<0.000000e+00> : vector<2x128xf32>
    %471 = tpu.matmul %469, %291, %cst_161 {dimension_numbers = #tpu.dot_dimension_numbers<[1], [0], [0], [1], [0, 0, 1, 1], [], []>} : vector<2x32xf32>, vector<32x128xf32>, vector<2x128xf32> -> vector<2x128xf32>
    %472 = arith.addf %470, %471 : vector<2x128xf32>
    %473 = vector.extract_strided_slice %472 {offsets = [0, 0], sizes = [2, 32], strides = [1, 1]} : vector<2x128xf32> to vector<2x32xf32>
    %cst_162 = arith.constant 5.000000e-01 : f32
    %474 = vector.broadcast %cst_162 : f32 to vector<2x32xf32>
    %475 = arith.mulf %474, %473 : vector<2x32xf32>
    %476 = math.tanh %475 : vector<2x32xf32>
    %cst_163 = arith.constant 1.000000e+00 : f32
    %477 = vector.broadcast %cst_163 : f32 to vector<2x32xf32>
    %478 = arith.addf %476, %477 : vector<2x32xf32>
    %cst_164 = arith.constant 5.000000e-01 : f32
    %479 = vector.broadcast %cst_164 : f32 to vector<2x32xf32>
    %480 = arith.mulf %479, %478 : vector<2x32xf32>
    %481 = vector.extract_strided_slice %472 {offsets = [0, 32], sizes = [2, 32], strides = [1, 1]} : vector<2x128xf32> to vector<2x32xf32>
    %cst_165 = arith.constant 5.000000e-01 : f32
    %482 = vector.broadcast %cst_165 : f32 to vector<2x32xf32>
    %483 = arith.mulf %482, %481 : vector<2x32xf32>
    %484 = math.tanh %483 : vector<2x32xf32>
    %cst_166 = arith.constant 1.000000e+00 : f32
    %485 = vector.broadcast %cst_166 : f32 to vector<2x32xf32>
    %486 = arith.addf %484, %485 : vector<2x32xf32>
    %cst_167 = arith.constant 5.000000e-01 : f32
    %487 = vector.broadcast %cst_167 : f32 to vector<2x32xf32>
    %488 = arith.mulf %487, %486 : vector<2x32xf32>
    %489 = vector.extract_strided_slice %472 {offsets = [0, 64], sizes = [2, 32], strides = [1, 1]} : vector<2x128xf32> to vector<2x32xf32>
    %490 = math.tanh %489 : vector<2x32xf32>
    %491 = vector.extract_strided_slice %472 {offsets = [0, 96], sizes = [2, 32], strides = [1, 1]} : vector<2x128xf32> to vector<2x32xf32>
    %cst_168 = arith.constant 5.000000e-01 : f32
    %492 = vector.broadcast %cst_168 : f32 to vector<2x32xf32>
    %493 = arith.mulf %492, %491 : vector<2x32xf32>
    %494 = math.tanh %493 : vector<2x32xf32>
    %cst_169 = arith.constant 1.000000e+00 : f32
    %495 = vector.broadcast %cst_169 : f32 to vector<2x32xf32>
    %496 = arith.addf %494, %495 : vector<2x32xf32>
    %cst_170 = arith.constant 5.000000e-01 : f32
    %497 = vector.broadcast %cst_170 : f32 to vector<2x32xf32>
    %498 = arith.mulf %497, %496 : vector<2x32xf32>
    %499 = arith.mulf %488, %467 : vector<2x32xf32>
    %500 = arith.mulf %480, %490 : vector<2x32xf32>
    %501 = arith.addf %499, %500 : vector<2x32xf32>
    %502 = math.tanh %501 : vector<2x32xf32>
    %503 = arith.mulf %498, %502 : vector<2x32xf32>
    %504 = vector.extract_strided_slice %295 {offsets = [12, 0], sizes = [2, 128], strides = [1, 1]} : vector<16x128xf32> to vector<2x128xf32>
    %cst_171 = arith.constant dense<0.000000e+00> : vector<2x128xf32>
    %505 = tpu.matmul %503, %291, %cst_171 {dimension_numbers = #tpu.dot_dimension_numbers<[1], [0], [0], [1], [0, 0, 1, 1], [], []>} : vector<2x32xf32>, vector<32x128xf32>, vector<2x128xf32> -> vector<2x128xf32>
    %506 = arith.addf %504, %505 : vector<2x128xf32>
    %507 = vector.extract_strided_slice %506 {offsets = [0, 0], sizes = [2, 32], strides = [1, 1]} : vector<2x128xf32> to vector<2x32xf32>
    %cst_172 = arith.constant 5.000000e-01 : f32
    %508 = vector.broadcast %cst_172 : f32 to vector<2x32xf32>
    %509 = arith.mulf %508, %507 : vector<2x32xf32>
    %510 = math.tanh %509 : vector<2x32xf32>
    %cst_173 = arith.constant 1.000000e+00 : f32
    %511 = vector.broadcast %cst_173 : f32 to vector<2x32xf32>
    %512 = arith.addf %510, %511 : vector<2x32xf32>
    %cst_174 = arith.constant 5.000000e-01 : f32
    %513 = vector.broadcast %cst_174 : f32 to vector<2x32xf32>
    %514 = arith.mulf %513, %512 : vector<2x32xf32>
    %515 = vector.extract_strided_slice %506 {offsets = [0, 32], sizes = [2, 32], strides = [1, 1]} : vector<2x128xf32> to vector<2x32xf32>
    %cst_175 = arith.constant 5.000000e-01 : f32
    %516 = vector.broadcast %cst_175 : f32 to vector<2x32xf32>
    %517 = arith.mulf %516, %515 : vector<2x32xf32>
    %518 = math.tanh %517 : vector<2x32xf32>
    %cst_176 = arith.constant 1.000000e+00 : f32
    %519 = vector.broadcast %cst_176 : f32 to vector<2x32xf32>
    %520 = arith.addf %518, %519 : vector<2x32xf32>
    %cst_177 = arith.constant 5.000000e-01 : f32
    %521 = vector.broadcast %cst_177 : f32 to vector<2x32xf32>
    %522 = arith.mulf %521, %520 : vector<2x32xf32>
    %523 = vector.extract_strided_slice %506 {offsets = [0, 64], sizes = [2, 32], strides = [1, 1]} : vector<2x128xf32> to vector<2x32xf32>
    %524 = math.tanh %523 : vector<2x32xf32>
    %525 = vector.extract_strided_slice %506 {offsets = [0, 96], sizes = [2, 32], strides = [1, 1]} : vector<2x128xf32> to vector<2x32xf32>
    %cst_178 = arith.constant 5.000000e-01 : f32
    %526 = vector.broadcast %cst_178 : f32 to vector<2x32xf32>
    %527 = arith.mulf %526, %525 : vector<2x32xf32>
    %528 = math.tanh %527 : vector<2x32xf32>
    %cst_179 = arith.constant 1.000000e+00 : f32
    %529 = vector.broadcast %cst_179 : f32 to vector<2x32xf32>
    %530 = arith.addf %528, %529 : vector<2x32xf32>
    %cst_180 = arith.constant 5.000000e-01 : f32
    %531 = vector.broadcast %cst_180 : f32 to vector<2x32xf32>
    %532 = arith.mulf %531, %530 : vector<2x32xf32>
    %533 = arith.mulf %522, %501 : vector<2x32xf32>
    %534 = arith.mulf %514, %524 : vector<2x32xf32>
    %535 = arith.addf %533, %534 : vector<2x32xf32>
    %536 = math.tanh %535 : vector<2x32xf32>
    %537 = arith.mulf %532, %536 : vector<2x32xf32>
    %538 = vector.extract_strided_slice %295 {offsets = [14, 0], sizes = [2, 128], strides = [1, 1]} : vector<16x128xf32> to vector<2x128xf32>
    %cst_181 = arith.constant dense<0.000000e+00> : vector<2x128xf32>
    %539 = tpu.matmul %537, %291, %cst_181 {dimension_numbers = #tpu.dot_dimension_numbers<[1], [0], [0], [1], [0, 0, 1, 1], [], []>} : vector<2x32xf32>, vector<32x128xf32>, vector<2x128xf32> -> vector<2x128xf32>
    %540 = arith.addf %538, %539 : vector<2x128xf32>
    %541 = vector.extract_strided_slice %540 {offsets = [0, 0], sizes = [2, 32], strides = [1, 1]} : vector<2x128xf32> to vector<2x32xf32>
    %cst_182 = arith.constant 5.000000e-01 : f32
    %542 = vector.broadcast %cst_182 : f32 to vector<2x32xf32>
    %543 = arith.mulf %542, %541 : vector<2x32xf32>
    %544 = math.tanh %543 : vector<2x32xf32>
    %cst_183 = arith.constant 1.000000e+00 : f32
    %545 = vector.broadcast %cst_183 : f32 to vector<2x32xf32>
    %546 = arith.addf %544, %545 : vector<2x32xf32>
    %cst_184 = arith.constant 5.000000e-01 : f32
    %547 = vector.broadcast %cst_184 : f32 to vector<2x32xf32>
    %548 = arith.mulf %547, %546 : vector<2x32xf32>
    %549 = vector.extract_strided_slice %540 {offsets = [0, 32], sizes = [2, 32], strides = [1, 1]} : vector<2x128xf32> to vector<2x32xf32>
    %cst_185 = arith.constant 5.000000e-01 : f32
    %550 = vector.broadcast %cst_185 : f32 to vector<2x32xf32>
    %551 = arith.mulf %550, %549 : vector<2x32xf32>
    %552 = math.tanh %551 : vector<2x32xf32>
    %cst_186 = arith.constant 1.000000e+00 : f32
    %553 = vector.broadcast %cst_186 : f32 to vector<2x32xf32>
    %554 = arith.addf %552, %553 : vector<2x32xf32>
    %cst_187 = arith.constant 5.000000e-01 : f32
    %555 = vector.broadcast %cst_187 : f32 to vector<2x32xf32>
    %556 = arith.mulf %555, %554 : vector<2x32xf32>
    %557 = vector.extract_strided_slice %540 {offsets = [0, 64], sizes = [2, 32], strides = [1, 1]} : vector<2x128xf32> to vector<2x32xf32>
    %558 = math.tanh %557 : vector<2x32xf32>
    %559 = vector.extract_strided_slice %540 {offsets = [0, 96], sizes = [2, 32], strides = [1, 1]} : vector<2x128xf32> to vector<2x32xf32>
    %cst_188 = arith.constant 5.000000e-01 : f32
    %560 = vector.broadcast %cst_188 : f32 to vector<2x32xf32>
    %561 = arith.mulf %560, %559 : vector<2x32xf32>
    %562 = math.tanh %561 : vector<2x32xf32>
    %cst_189 = arith.constant 1.000000e+00 : f32
    %563 = vector.broadcast %cst_189 : f32 to vector<2x32xf32>
    %564 = arith.addf %562, %563 : vector<2x32xf32>
    %cst_190 = arith.constant 5.000000e-01 : f32
    %565 = vector.broadcast %cst_190 : f32 to vector<2x32xf32>
    %566 = arith.mulf %565, %564 : vector<2x32xf32>
    %567 = arith.mulf %556, %535 : vector<2x32xf32>
    %568 = arith.mulf %548, %558 : vector<2x32xf32>
    %569 = arith.addf %567, %568 : vector<2x32xf32>
    %570 = math.tanh %569 : vector<2x32xf32>
    %571 = arith.mulf %566, %570 : vector<2x32xf32>
    %c1_191 = arith.constant 1 : index
    %c0_192 = arith.constant 0 : index
    %c0_193 = arith.constant 0 : index
    %572 = vector.load %arg12[%c1_191, %c0_192, %c0_193] : memref<2x2x32xf32, #tpu.memory_space<vmem>>, vector<1x2x32xf32>
    %573 = vector.shape_cast %572 : vector<1x2x32xf32> to vector<2x32xf32>
    %574 = vector.shape_cast %571 : vector<2x32xf32> to vector<1x2x32xf32>
    tpu.vector_store %arg12[%c1_191, %c0_192, %c0_193], %574 {strides = array<i32>} : memref<2x2x32xf32, #tpu.memory_space<vmem>>, vector<1x2x32xf32>,
    %c1_194 = arith.constant 1 : index
    %c0_195 = arith.constant 0 : index
    %c0_196 = arith.constant 0 : index
    %575 = vector.load %arg13[%c1_194, %c0_195, %c0_196] : memref<2x2x32xf32, #tpu.memory_space<vmem>>, vector<1x2x32xf32>
    %576 = vector.shape_cast %575 : vector<1x2x32xf32> to vector<2x32xf32>
    %577 = vector.shape_cast %569 : vector<2x32xf32> to vector<1x2x32xf32>
    tpu.vector_store %arg13[%c1_194, %c0_195, %c0_196], %577 {strides = array<i32>} : memref<2x2x32xf32, #tpu.memory_space<vmem>>, vector<1x2x32xf32>,
    %cst_197 = arith.constant 0.000000e+00 : f32
    %578 = vector.broadcast %cst_197 : f32 to vector<2x32xf32>
    %579 = arith.maximumf %571, %578 : vector<2x32xf32>
    %c0_198 = arith.constant 0 : index
    %c0_199 = arith.constant 0 : index
    %580 = vector.load %arg9[%c0_198, %c0_199] : memref<32x4xf32, #tpu.memory_space<vmem>>, vector<32x4xf32>
    %cst_200 = arith.constant dense<0.000000e+00> : vector<2x4xf32>
    %581 = tpu.matmul %579, %580, %cst_200 {dimension_numbers = #tpu.dot_dimension_numbers<[1], [0], [0], [1], [0, 0, 1, 1], [], []>} : vector<2x32xf32>, vector<32x4xf32>, vector<2x4xf32> -> vector<2x4xf32>
    %c0_201 = arith.constant 0 : index
    %c0_202 = arith.constant 0 : index
    %582 = vector.load %arg10[%c0_201, %c0_202] : memref<1x4xf32, #tpu.memory_space<vmem>>, vector<1x4xf32>
    %583 = vector.broadcast %582 : vector<1x4xf32> to vector<2x4xf32>
    %584 = arith.addf %581, %583 : vector<2x4xf32>
    %c0_203 = arith.constant 0 : index
    %c0_204 = arith.constant 0 : index
    %585 = vector.load %arg11[%c0_203, %c0_204] : memref<2x4xf32, #tpu.memory_space<vmem>>, vector<2x4xf32>
    tpu.vector_store %arg11[%c0_203, %c0_204], %584 {strides = array<i32>} : memref<2x4xf32, #tpu.memory_space<vmem>>, vector<2x4xf32>,
    return
  }
}

</mosaic_0001>

<bundles_post_ra>
// kernel: lstm_net_forward.1
= control target key start
LH: loop header
LB: loop body
LE: loop exit
PB: predicated region body
PF: predicated region fallthrough
CT: control target
= control target key end

     0   :  { %19 = vsyncpa [#allocation3], 0  ;;  %s3326_s0 = inlined_call_operand.vmem [shape: f32[16,4], index: 0, kind: input, shape index: {}]   ;;  %s3327_s1 = inlined_call_operand.hbm [shape: f32[2,2,32], index: 1, kind: input, shape index: {}]   ;;  %s3328_s2 = inlined_call_operand.hbm [shape: f32[2,2,32], index: 2, kind: input, shape index: {}]   ;;  %s3329_s3 = inlined_call_operand.hbm [shape: f32[4,128], index: 3, kind: input, shape index: {}]   ;;  %s3330_s4 = inlined_call_operand.vmem [shape: f32[32,128], index: 4, kind: input, shape index: {}]   ;;  %s3331_s5 = inlined_call_operand.vmem [shape: f32[1,128], index: 5, kind: input, shape index: {}]   ;;  %s3332_s6 = inlined_call_operand.vmem [shape: f32[32,128], index: 6, kind: input, shape index: {}]   ;;  %s3333_s7 = inlined_call_operand.vmem [shape: f32[32,128], index: 7, kind: input, shape index: {}]   ;;  %s3334_s8 = inlined_call_operand.vmem [shape: f32[1,128], index: 8, kind: input, shape index: {}]   ;;  %s3335_s9 = inlined_call_operand.vmem [shape: f32[32,4], index: 9, kind: input, shape index: {}]   ;;  %s3336_s10 = inlined_call_operand.hbm [shape: f32[1,4], index: 10, kind: input, shape index: {}]   ;;  %s3337_s11 = inlined_call_operand.hbm [shape: f32[2,4], index: 11, kind: output, shape index: {0}]   ;;  %s3338_s12 = inlined_call_operand.hbm [shape: f32[2,2,32], index: 12, kind: output, shape index: {1}]   ;;  %s3339_s13 = inlined_call_operand.hbm [shape: f32[2,2,32], index: 13, kind: output, shape index: {2}]  }
   0x1   :  { %20 = vsyncpa [#allocation6], 0 }
   0x2   :  { %21 = vsyncpa [#allocation9], 0 }
   0x3   :  { %22 = vsyncpa [#allocation4], 0 }
   0x4   :  { %23 = vsyncpa [#allocation12], 0  ;;  %s2836_s25 = smov [#allocation5]   ;;  %s2837_s27 = smov [#allocation2]  }
   0x5   :  { %s43_s26 = sshll.u32 %s2836_s25, 4  ;;  %s31_s28 = sshll.u32 %s2837_s27, 4  ;;  %s44_s26 = int_to_ptr.vmem [resolvable:$true] %s43_s26  ;;  %s2920_s28 = int_to_ptr.vmem [resolvable:$true] %s31_s28 }
   0x6   :  { %s2672_s14 = scalar_lea.hbm %s3328_s2, 64 }
   0x7   :  { %p2673_p0 = scmp.ne.s32.totalorder %s3328_s2, %s2672_s14  ;;  %p2676_p1 = scmp.lt.u32.totalorder %s2672_s14, %s3328_s2 }
   0x9   :  { %p2678_p2 = pnand %p2676_p1, %p2673_p0 }
   0xb   :  { %2681 = shalt.err (!%p2678_p2)
}
   0xc   :  { %s2682_s19 = scalar_lea.vmem %s44_s26, 64  ;;  %p2687_p4 = scmp.lt.s32.totalorder %s44_s26, %s44_s26 }
   0xd   :  { %p2683_p3 = scmp.ne.s32.totalorder %s44_s26, %s2682_s19  ;;  %p2688_p5 = scmp.lt.s32.totalorder %s2682_s19, %s2682_s19 }
   0xf   :  { %p2689_p6 = por %p2688_p5, %p2687_p4 }
  0x11   :  { %p2690_p7 = pnand %p2689_p6, %p2683_p3 }
  0x13   :  { %2693 = shalt.err (!%p2690_p7)
}
  0x14   :  { %s2838_s20 = smov 32   ;;  %s2839_s21 = smov 2  }
  0x15   :  { %49 = dma.hbm_to_vmem [thread:$0]  %s3328_s2, 64, %s44_s26, [#allocation6], %s2838_s20, %s2838_s20, %s2839_s21  }
  0x16   :  { %s2694_s27 = scalar_lea.hbm %s3327_s1, 64 }
  0x17   :  { %p2695_p8 = scmp.ne.s32.totalorder %s3327_s1, %s2694_s27  ;;  %p2698_p9 = scmp.lt.u32.totalorder %s2694_s27, %s3327_s1 }
  0x19   :  { %p2700_p10 = pnand %p2698_p9, %p2695_p8 }
  0x1b   :  { %2703 = shalt.err (!%p2700_p10)
}
  0x1c   :  { %s2704_s16 = scalar_lea.vmem %s2920_s28, 64  ;;  %p2709_p12 = scmp.lt.s32.totalorder %s2920_s28, %s2920_s28 }
  0x1d   :  { %p2705_p11 = scmp.ne.s32.totalorder %s2920_s28, %s2704_s16  ;;  %p2710_p13 = scmp.lt.s32.totalorder %s2704_s16, %s2704_s16 }
  0x1f   :  { %p2711_p0 = por %p2710_p13, %p2709_p12 }
  0x21   :  { %p2712_p1 = pnand %p2711_p0, %p2705_p11 }
  0x23   :  { %2715 = shalt.err (!%p2712_p1)
}
  0x24   :  { %37 = dma.hbm_to_vmem [thread:$0]  %s3327_s1, 64, %s2920_s28, [#allocation3], %s2838_s20, %s2838_s20, %s2839_s21  }
  0x25   :  { %s2840_s17 = smov [#allocation7]   ;;  %s2841_s19 = smov [#allocation8]  }
  0x26   :  { %s56_s18 = sshll.u32 %s2840_s17, 4  ;;  %s78_s22 = sshll.u32 %s2841_s19, 4  ;;  %s57_s18 = int_to_ptr.vmem [resolvable:$true] %s56_s18  ;;  %s79_s22 = int_to_ptr.vmem [resolvable:$true] %s78_s22 }
  0x27   :  { %s2716_s25 = scalar_lea.hbm %s3329_s3, 64 }
  0x28   :  { %p2717_p2 = scmp.ne.s32.totalorder %s3329_s3, %s2716_s25  ;;  %p2720_p3 = scmp.lt.u32.totalorder %s2716_s25, %s3329_s3 }
  0x2a   :  { %p2722_p4 = pnand %p2720_p3, %p2717_p2 }
  0x2c   :  { %2725 = shalt.err (!%p2722_p4)
}
  0x2d   :  { %s2726_s1 = scalar_lea.vmem %s57_s18, 64  ;;  %p2731_p6 = scmp.lt.s32.totalorder %s57_s18, %s57_s18 }
  0x2e   :  { %p2727_p5 = scmp.ne.s32.totalorder %s57_s18, %s2726_s1  ;;  %p2732_p7 = scmp.lt.s32.totalorder %s2726_s1, %s2726_s1 }
  0x30   :  { %p2733_p8 = por %p2732_p7, %p2731_p6 }
  0x32   :  { %p2734_p9 = pnand %p2733_p8, %p2727_p5 }
  0x34   :  { %2737 = shalt.err (!%p2734_p9)
}
  0x35   :  { %59 = dma.hbm_to_vmem [thread:$0]  %s3329_s3, 64, %s57_s18, [#allocation6]  }
  0x36   :  { %s2738_s26 = scalar_lea.hbm %s3336_s10, 16 }
  0x37   :  { %p2739_p10 = scmp.ne.s32.totalorder %s3336_s10, %s2738_s26  ;;  %p2742_p11 = scmp.lt.u32.totalorder %s2738_s26, %s3336_s10 }
  0x39   :  { %p2744_p12 = pnand %p2742_p11, %p2739_p10 }
  0x3b   :  { %2747 = shalt.err (!%p2744_p12)
}
  0x3c   :  { %s2748_s25 = scalar_lea.vmem %s79_s22, 16  ;;  %s2752_s27 = scalar_lea.vmem %s79_s22, 32 }
  0x3d   :  { %p2749_p13 = scmp.ne.s32.totalorder %s79_s22, %s2748_s25  ;;  %p2753_p0 = scmp.lt.s32.totalorder %s79_s22, %s79_s22 }
  0x3e   :  { %p2754_p1 = scmp.lt.s32.totalorder %s2752_s27, %s2748_s25 }
  0x40   :  { %p2755_p2 = por %p2754_p1, %p2753_p0 }
  0x42   :  { %p2756_p3 = pnand %p2755_p2, %p2749_p13 }
  0x44   :  { %2759 = shalt.err (!%p2756_p3)
}
  0x45   :  { %81 = dma.hbm_to_vmem [thread:$0]  %s3336_s10, 16, %s79_s22, [#allocation9]  }
  0x46   :  { %2826 = dma.done.wait [#allocation3], 64  }
  0x47   :  { %2827 = vsyncadd [#allocation3], 4294967232 }
  0x48   :  { %2828 = dma.done.wait [#allocation6], 128  }
  0x49   :  { %2829 = vsyncadd [#allocation6], 4294967168 }
  0x4a   :  { %2830 = dma.done.wait [#allocation9], 16  }
  0x4b   :  { %2831 = vsyncadd [#allocation9], 4294967280  ;;  %v2842_v0 = vmov 0.0|0.0   ;;  %vm2843_vm0 = vmmov 0   ;;  %v2844_v1 = vmov 0.0   ;;  %vm115_vm1 = vcmask 1043456  }
  0x4c   :  { %2452 = vmatprep.subr.bf16.mxu1 %v2842_v0  ;;  %2262 = vmatprep.mubr.msk.f32.mxu1 %vm2843_vm0, %v2844_v1  ;;  %vm108_vm2 = vcmask 31744   ;;  %v97_v2 = vld [vmem:[%s3330_s4] sm:$0xff]  ;;  %v98_v3 = vld [vmem:[%s3330_s4 + $0x8] sm:$0xff]  ;;  %v99_v8 = vld [vmem:[%s3330_s4 + $0x10] sm:$0xff]  ;;  %vm196_vm3 = vcmask 261120   ;;  %s2845_s19 = smov 64  }
  0x4d   :  { %v96_v4 = vld [vmem:[#allocation7] sm:$0xf]  ;;  %v2990_v5 = vpack.c.bf16 %v98_v3, %v97_v2  ;;  %v94_v6 = vld [vmem:[%s3326_s0] sm:$0xff]  ;;  %v100_v9 = vld [vmem:[%s3330_s4 + $0x18] sm:$0xff]  ;;  %vm1038_vm4 = vcmask 1041408   ;;  %vm1041_vm5 = vcmask 1045504  }
  0x4e   :  { %2249 = vmatprep.subr.msk.mxu0 %vm115_vm1, %v96_v4  ;;  %v95_v7 = vld [vmem:[%s3326_s0 + $0x8] sm:$0xff]  ;;  %2251 = vmatprep.mubr.msk.f32.mxu0 %vm108_vm2, %v94_v6  ;;  %v3007_v10 = vpack.c.bf16 %v100_v9, %v99_v8  ;;  %v194_v11 = vld [vmem:[#allocation2] sm:$0x3]  ;;  %v195_v21 = vld [vmem:[#allocation5] sm:$0x3]  ;;  %vm1031_vm6 = vcmask 261126  }
  0x4f   :  { %2250 = vmatpush3.msk.msra.mxu0 %vm115_vm1, %v96_v4  ;;  %2454 = vmatpush3.bf16.msra.mxu1 %v2990_v5  ;;  %v2130_v12 = vld [vmem:[%s3331_s5] ss:$0 sm:$0xff] }
  0x50   :  { %2252 = vmatmul.mubr.msk.f32.vlgmr.msra.gmra.mrb[0].mxu0 %vm108_vm2, %v95_v7  ;;  %2455 = vmatprep.subr.bf16.mxu1 %v2842_v0 }
  0x51   :  { %2458 = vmatprep.subr.bf16.mxu0 %v2842_v0  ;;  %2273 = vmatprep.mubr.msk.f32.mxu0 %vm2843_vm0, %v2844_v1 }
  0x52   :  { %2460 = vmatpush3.bf16.msra.mxu0 %v2990_v5 }
  0x53   :  { %2461 = vmatprep.subr.bf16.mxu0 %v2842_v0  ;;  %2457 = vmatpush3.bf16.msra.mxu1 %v3007_v10 }
  0x54   :  { %2464 = vmatprep.subr.bf16.mxu1 %v2842_v0 }
  0x56   :  { %2463 = vmatpush3.bf16.msra.mxu0 %v3007_v10  ;;  %2263 = vmatmul.mubr.msk.f32.vlgmr.msra.gmra.mrb[0].mxu1 %vm196_vm3, %v194_v11 }
  0x57   :  { %2470 = vmatprep.subr.bf16.mxu0 %v2842_v0  ;;  %2466 = vmatpush3.bf16.msra.mxu1 %v2990_v5 }
  0x58   :  { %2284 = vmatprep.mubr.msk.f32.mxu1 %vm2843_vm0, %v2844_v1  ;;  %2467 = vmatprep.subr.bf16.mxu1 %v2842_v0 }
  0x5b   :  { %2469 = vmatpush3.bf16.msra.mxu1 %v3007_v10 }
  0x5c   :  { %2476 = vmatprep.subr.bf16.mxu1 %v2842_v0 }
 0x123   :  { %v2253_v13 = vpop.f32.mrb[0].mxu0 }
 0x124   :  { %v3029_v14 = vadd.f32 %v2253_v13, %v2130_v12  ;;  %v185_v15 = vpop.f32.mrb[1].mxu0 }
 0x125   :  { %v3031_v16 = vadd.f32 %v2130_v12, %v185_v15 }
 0x129   :  { %v266_v17 = vpop.f32.mrb[0].mxu1 }
 0x12a   :  { %v270_v18 = vadd.f32 %v266_v17, %v3031_v16  ;;  %v2264_v19 = vpop.f32.mrb[1].mxu1 }
 0x12c   :  { %2576 = vtanh.f32 %v270_v18  ;;  %v271_v22 = vmul.f32 0.5, %v270_v18 }
 0x12e   :  { %2578 = vtanh.f32 %v271_v22 }
 0x136   :  { %v2577_v20 = vpop.eup %2576 }
 0x137   :  { %282 = vrot.lane.b32.xlu0 %v2577_v20, %s2845_s19 }
 0x138   :  { %v2579_v23 = vpop.eup %2578 }
 0x139   :  { %v273_v24 = vadd.f32 1.0, %v2579_v23 }
 0x13b   :  { %277 = vrot.lane.b32.xlu0 %v195_v21, %s2838_s20  ;;  %v274_v25 = vmul.f32 0.5, %v273_v24 }
 0x1a9   :  { %v283_v26 = vpop.permute.xlu0 %282 }
 0x1aa   :  { %v285_v27 = vmul.f32 %v283_v26, %v274_v25 }
 0x1ac   :  { %287 = vrot.lane.b32.xlu1 %v285_v27, %s2838_s20 }
 0x1ad   :  { %v278_v28 = vpop.permute.xlu0 %277 }
 0x1ae   :  { %v280_v29 = vmul.f32 %v278_v28, %v274_v25 }
 0x21e   :  { %v288_v30 = vpop.permute.xlu1 %287 }
 0x21f   :  { %v290_v31 = vadd.f32 %v288_v30, %v280_v29 }
 0x221   :  { %2580 = vtanh.f32 %v290_v31  ;;  %v382_v47 = vrot.slane %v290_v31, 6 }
 0x22b   :  { %v2581_v32 = vpop.eup %2580 }
 0x22c   :  { %293 = vrot.lane.b32.xlu1 %v2581_v32, %s2845_s19 }
 0x29e   :  { %v294_v33 = vpop.permute.xlu1 %293 }
 0x29f   :  { %v3038_v34 = vmul.f32 %v294_v33, %v274_v25 }
 0x2a1   :  { %298 = vrot.lane.b32.xlu0 %v3038_v34, %s2838_s20 }
 0x313   :  { %v299_v35 = vpop.permute.xlu0 %298 }
 0x314   :  { %2274 = vmatmul.mubr.msk.f32.vlgmr.msra.gmra.mrb[2].mxu0 %vm196_vm3, %v299_v35 }
 0x315   :  { %2472 = vmatpush3.bf16.msra.mxu0 %v2990_v5  ;;  %2295 = vmatprep.mubr.msk.f32.mxu0 %vm2843_vm0, %v2844_v1 }
 0x316   :  { %2473 = vmatprep.subr.bf16.mxu0 %v2842_v0 }
 0x319   :  { %2475 = vmatpush3.bf16.msra.mxu0 %v3007_v10 }
 0x31a   :  { %2482 = vmatprep.subr.bf16.mxu0 %v2842_v0 }
 0x3e7   :  { %v368_v36 = vpop.f32.mrb[2].mxu0 }
 0x3e8   :  { %v373_v37 = vrot.slane %v368_v36, 6  ;;  %v2275_v38 = vpop.f32.mrb[3].mxu0 }
 0x3ea   :  { %v375_v39 = vadd.f32 %v373_v37, %v3031_v16 }
 0x3ec   :  { %2582 = vtanh.f32 %v375_v39  ;;  %v376_v41 = vmul.f32 0.5, %v375_v39 }
 0x3ee   :  { %2584 = vtanh.f32 %v376_v41 }
 0x3f6   :  { %v2583_v40 = vpop.eup %2582 }
 0x3f7   :  { %386 = vrot.lane.b32.xlu1 %v2583_v40, %s2845_s19 }
 0x3f8   :  { %v2585_v42 = vpop.eup %2584 }
 0x3f9   :  { %v378_v43 = vadd.f32 1.0, %v2585_v42 }
 0x3fb   :  { %v379_v44 = vmul.f32 0.5, %v378_v43 }
 0x3fd   :  { %v384_v48 = vmul.f32 %v382_v47, %v379_v44 }
 0x469   :  { %v387_v45 = vpop.permute.xlu1 %386 }
 0x46a   :  { %v389_v46 = vmul.f32 %v387_v45, %v379_v44 }
 0x46c   :  { %391 = vrot.lane.b32.xlu0 %v389_v46, %s2838_s20 }
 0x4de   :  { %v392_v49 = vpop.permute.xlu0 %391 }
 0x4df   :  { %v394_v50 = vadd.f32 %v392_v49, %v384_v48 }
 0x4e1   :  { %2586 = vtanh.f32 %v394_v50  ;;  %v487_v6 = vrot.slane %v394_v50, 6 }
 0x4eb   :  { %v2587_v51 = vpop.eup %2586 }
 0x4ec   :  { %397 = vrot.lane.b32.xlu1 %v2587_v51, %s2845_s19 }
 0x55e   :  { %v398_v52 = vpop.permute.xlu1 %397 }
 0x55f   :  { %v400_v53 = vmul.f32 %v398_v52, %v379_v44 }
 0x561   :  { %v402_v54 = vrot.slane %v400_v53, 2  ;;  %v1039_v15 = vsel %vm1038_vm4, %v3038_v34, %v400_v53 }
 0x563   :  { %403 = vrot.lane.b32.xlu0 %v402_v54, %s2838_s20 }
 0x5d5   :  { %v404_v55 = vpop.permute.xlu0 %403 }
 0x5d6   :  { %2285 = vmatmul.mubr.msk.f32.vlgmr.msra.gmra.mrb[2].mxu1 %vm196_vm3, %v404_v55 }
 0x5d7   :  { %2478 = vmatpush3.bf16.msra.mxu1 %v2990_v5  ;;  %2306 = vmatprep.mubr.msk.f32.mxu1 %vm2843_vm0, %v2844_v1 }
 0x5d8   :  { %2479 = vmatprep.subr.bf16.mxu1 %v2842_v0 }
 0x5db   :  { %2481 = vmatpush3.bf16.msra.mxu1 %v3007_v10 }
 0x5dc   :  { %2488 = vmatprep.subr.bf16.mxu1 %v2842_v0 }
 0x6a9   :  { %v473_v56 = vpop.f32.mrb[2].mxu1 }
 0x6aa   :  { %v478_v57 = vrot.slane %v473_v56, 4  ;;  %v2286_v58 = vpop.f32.mrb[3].mxu1 }
 0x6ac   :  { %v480_v59 = vadd.f32 %v478_v57, %v3031_v16 }
 0x6ae   :  { %2588 = vtanh.f32 %v480_v59  ;;  %v481_v61 = vmul.f32 0.5, %v480_v59 }
 0x6b0   :  { %2590 = vtanh.f32 %v481_v61 }
 0x6b8   :  { %v2589_v60 = vpop.eup %2588 }
 0x6b9   :  { %491 = vrot.lane.b32.xlu1 %v2589_v60, %s2845_s19 }
 0x6ba   :  { %v2591_v62 = vpop.eup %2590 }
 0x6bb   :  { %v483_v63 = vadd.f32 1.0, %v2591_v62 }
 0x6bd   :  { %v484_v2 = vmul.f32 0.5, %v483_v63 }
 0x6bf   :  { %v489_v7 = vmul.f32 %v487_v6, %v484_v2 }
 0x72b   :  { %v492_v3 = vpop.permute.xlu1 %491 }
 0x72c   :  { %v494_v4 = vmul.f32 %v492_v3, %v484_v2 }
 0x72e   :  { %496 = vrot.lane.b32.xlu0 %v494_v4, %s2838_s20 }
 0x7a0   :  { %v497_v8 = vpop.permute.xlu0 %496 }
 0x7a1   :  { %v499_v9 = vadd.f32 %v497_v8, %v489_v7 }
 0x7a3   :  { %2592 = vtanh.f32 %v499_v9  ;;  %v592_v31 = vrot.slane %v499_v9, 6 }
 0x7ad   :  { %v2593_v11 = vpop.eup %2592 }
 0x7ae   :  { %502 = vrot.lane.b32.xlu1 %v2593_v11, %s2845_s19 }
 0x820   :  { %v503_v12 = vpop.permute.xlu1 %502 }
 0x821   :  { %v505_v13 = vmul.f32 %v503_v12, %v484_v2 }
 0x823   :  { %v507_v17 = vrot.slane %v505_v13, 4  ;;  %v1040_v18 = vsel %vm115_vm1, %v1039_v15, %v505_v13 }
 0x825   :  { %508 = vrot.lane.b32.xlu0 %v507_v17, %s2838_s20 }
 0x897   :  { %v509_v19 = vpop.permute.xlu0 %508 }
 0x898   :  { %2296 = vmatmul.mubr.msk.f32.vlgmr.msra.gmra.mrb[4].mxu0 %vm196_vm3, %v509_v19 }
 0x899   :  { %2484 = vmatpush3.bf16.msra.mxu0 %v2990_v5  ;;  %2317 = vmatprep.mubr.msk.f32.mxu0 %vm2843_vm0, %v2844_v1 }
 0x89a   :  { %2485 = vmatprep.subr.bf16.mxu0 %v2842_v0 }
 0x89d   :  { %2487 = vmatpush3.bf16.msra.mxu0 %v3007_v10 }
 0x89e   :  { %2494 = vmatprep.subr.bf16.mxu0 %v2842_v0 }
 0x96b   :  { %v578_v20 = vpop.f32.mrb[4].mxu0 }
 0x96c   :  { %v583_v21 = vrot.slane %v578_v20, 2  ;;  %v2297_v22 = vpop.f32.mrb[5].mxu0 }
 0x96e   :  { %v585_v23 = vadd.f32 %v583_v21, %v3031_v16 }
 0x970   :  { %2594 = vtanh.f32 %v585_v23  ;;  %v586_v25 = vmul.f32 0.5, %v585_v23 }
 0x972   :  { %2596 = vtanh.f32 %v586_v25 }
 0x97a   :  { %v2595_v24 = vpop.eup %2594 }
 0x97b   :  { %596 = vrot.lane.b32.xlu1 %v2595_v24, %s2845_s19 }
 0x97c   :  { %v2597_v26 = vpop.eup %2596 }
 0x97d   :  { %v588_v27 = vadd.f32 1.0, %v2597_v26 }
 0x97f   :  { %v589_v28 = vmul.f32 0.5, %v588_v27 }
 0x981   :  { %v594_v32 = vmul.f32 %v592_v31, %v589_v28 }
 0x9ed   :  { %v597_v29 = vpop.permute.xlu1 %596 }
 0x9ee   :  { %v599_v30 = vmul.f32 %v597_v29, %v589_v28 }
 0x9f0   :  { %601 = vrot.lane.b32.xlu0 %v599_v30, %s2838_s20 }
 0xa62   :  { %v602_v33 = vpop.permute.xlu0 %601 }
 0xa63   :  { %v604_v34 = vadd.f32 %v602_v33, %v594_v32 }
 0xa65   :  { %2598 = vtanh.f32 %v604_v34  ;;  %v694_v50 = vrot.slane %v604_v34, 6 }
 0xa6f   :  { %v2599_v35 = vpop.eup %2598 }
 0xa70   :  { %607 = vrot.lane.b32.xlu1 %v2599_v35, %s2845_s19 }
 0xae2   :  { %v608_v16 = vpop.permute.xlu1 %607 }
 0xae3   :  { %v610_v36 = vmul.f32 %v608_v16, %v589_v28 }
 0xae5   :  { %v612_v37 = vrot.slane %v610_v36, 6  ;;  %v3081_v38 = vsel %vm1041_vm5, %v1040_v18, %v610_v36 }
 0xae7   :  { %613 = vrot.lane.b32.xlu0 %v612_v37, %s2838_s20 }
 0xb59   :  { %v614_v39 = vpop.permute.xlu0 %613 }
 0xb5a   :  { %2307 = vmatmul.mubr.msk.f32.vlgmr.msra.gmra.mrb[4].mxu1 %vm196_vm3, %v614_v39 }
 0xb5b   :  { %2490 = vmatpush3.bf16.msra.mxu1 %v2990_v5  ;;  %2328 = vmatprep.mubr.msk.f32.mxu1 %vm2843_vm0, %v2844_v1 }
 0xb5c   :  { %2491 = vmatprep.subr.bf16.mxu1 %v2842_v0 }
 0xb5f   :  { %2493 = vmatpush3.bf16.msra.mxu1 %v3007_v10 }
 0xc2d   :  { %v683_v40 = vpop.f32.mrb[4].mxu1 }
 0xc2e   :  { %v687_v41 = vadd.f32 %v683_v40, %v3029_v14  ;;  %v2308_v42 = vpop.f32.mrb[5].mxu1 }
 0xc30   :  { %2600 = vtanh.f32 %v687_v41  ;;  %v688_v44 = vmul.f32 0.5, %v687_v41 }
 0xc32   :  { %2602 = vtanh.f32 %v688_v44 }
 0xc3a   :  { %v2601_v43 = vpop.eup %2600 }
 0xc3b   :  { %698 = vrot.lane.b32.xlu1 %v2601_v43, %s2845_s19 }
 0xc3c   :  { %v2603_v45 = vpop.eup %2602 }
 0xc3d   :  { %v690_v46 = vadd.f32 1.0, %v2603_v45 }
 0xc3f   :  { %v691_v47 = vmul.f32 0.5, %v690_v46 }
 0xc41   :  { %v696_v51 = vmul.f32 %v694_v50, %v691_v47 }
 0xcad   :  { %v699_v48 = vpop.permute.xlu1 %698 }
 0xcae   :  { %v701_v49 = vmul.f32 %v699_v48, %v691_v47 }
 0xcb0   :  { %703 = vrot.lane.b32.xlu0 %v701_v49, %s2838_s20 }
 0xd22   :  { %v704_v52 = vpop.permute.xlu0 %703 }
 0xd23   :  { %v706_v53 = vadd.f32 %v704_v52, %v696_v51 }
 0xd25   :  { %2604 = vtanh.f32 %v706_v53 }
 0xd2f   :  { %v2605_v54 = vpop.eup %2604 }
 0xd30   :  { %709 = vrot.lane.b32.xlu1 %v2605_v54, %s2845_s19 }
 0xda2   :  { %v710_v55 = vpop.permute.xlu1 %709 }
 0xda3   :  { %v712_v56 = vmul.f32 %v710_v55, %v691_v47  ;;  %v1046_v55 = vld [vmem:[%s3332_s6] sm:$0xff] }
 0xda5   :  { %714 = vrot.lane.b32.xlu0 %v712_v56, %s2838_s20 }
 0xe17   :  { %v715_v57 = vpop.permute.xlu0 %714 }
 0xe18   :  { %2318 = vmatmul.mubr.msk.f32.vlgmr.msra.gmra.mrb[6].mxu0 %vm196_vm3, %v715_v57 }
 0xe19   :  { %2496 = vmatpush3.bf16.msra.mxu0 %v2990_v5  ;;  %2339 = vmatprep.mubr.msk.f32.mxu0 %vm2843_vm0, %v2844_v1 }
 0xe1a   :  { %2497 = vmatprep.subr.bf16.mxu0 %v2842_v0 }
 0xe1d   :  { %2499 = vmatpush3.bf16.msra.mxu0 %v3007_v10  ;;  %v798_v10 = vrot.slane %v706_v53, 6 }
 0xe1e   :  { %2508 = vmatprep.subr.bf16.mxu0 %v2842_v0 }
 0xeeb   :  { %v784_v58 = vpop.f32.mrb[6].mxu0 }
 0xeec   :  { %v789_v59 = vrot.slane %v784_v58, 6  ;;  %v2319_v60 = vpop.f32.mrb[7].mxu0  ;;  %v1051_v58 = vld [vmem:[%s3333_s7 + $0x8] sm:$0xff] }
 0xeed   :  { %v1049_v60 = vld [vmem:[%s3332_s6 + $0x18] sm:$0xff] }
 0xeee   :  { %v791_v61 = vadd.f32 %v789_v59, %v3029_v14  ;;  %v1048_v59 = vld [vmem:[%s3332_s6 + $0x10] sm:$0xff] }
 0xef0   :  { %2606 = vtanh.f32 %v791_v61  ;;  %v792_v63 = vmul.f32 0.5, %v791_v61 }
 0xef2   :  { %2608 = vtanh.f32 %v792_v63  ;;  %v1052_v63 = vld [vmem:[%s3333_s7 + $0x10] sm:$0xff] }
 0xefa   :  { %v2607_v62 = vpop.eup %2606 }
 0xefb   :  { %802 = vrot.lane.b32.xlu1 %v2607_v62, %s2845_s19  ;;  %v2504_v62 = vpack.c.bf16 %v1049_v60, %v1048_v59 }
 0xefc   :  { %v2609_v5 = vpop.eup %2608 }
 0xefd   :  { %v794_v2 = vadd.f32 1.0, %v2609_v5  ;;  %v1053_v5 = vld [vmem:[%s3333_s7 + $0x18] sm:$0xff] }
 0xeff   :  { %v795_v3 = vmul.f32 0.5, %v794_v2  ;;  %v3154_v2 = vpack.c.bf16 %v1053_v5, %v1052_v63 }
 0xf01   :  { %v800_v7 = vmul.f32 %v798_v10, %v795_v3 }
 0xf6d   :  { %v803_v4 = vpop.permute.xlu1 %802 }
 0xf6e   :  { %v805_v6 = vmul.f32 %v803_v4, %v795_v3  ;;  %v1147_v4 = vld [vmem:[#allocation2 + $0x2] sm:$0x3] }
 0xf70   :  { %807 = vrot.lane.b32.xlu0 %v805_v6, %s2838_s20 }
 0xfe2   :  { %v808_v8 = vpop.permute.xlu0 %807 }
 0xfe3   :  { %v810_v9 = vadd.f32 %v808_v8, %v800_v7  ;;  %v1149_v8 = vld [vmem:[#allocation5 + $0x2] sm:$0x3] }
 0xfe5   :  { %2610 = vtanh.f32 %v810_v9  ;;  %v903_v29 = vrot.slane %v810_v9, 6 }
 0xfef   :  { %v2611_v11 = vpop.eup %2610 }
 0xff0   :  { %813 = vrot.lane.b32.xlu1 %v2611_v11, %s2845_s19 }
0x1062   :  { %v814_v12 = vpop.permute.xlu1 %813 }
0x1063   :  { %v816_v13 = vmul.f32 %v814_v12, %v795_v3 }
0x1065   :  { %v818_v15 = vrot.slane %v816_v13, 2  ;;  %v1043_v16 = vsel %vm1038_vm4, %v712_v56, %v816_v13  ;;  %v1047_v56 = vld [vmem:[%s3332_s6 + $0x8] sm:$0xff]  ;;  %v2142_v13 = vld [vmem:[%s3334_s8] ss:$0 sm:$0xff] }
0x1066   :  { %v2500_v57 = vpack.c.bf16 %v1047_v56, %v1046_v55 }
0x1067   :  { %819 = vrot.lane.b32.xlu0 %v818_v15, %s2838_s20 }
0x1068   :  { %2501 = vmatprep.subr.bf16.mxu1 %v2500_v57 }
0x10d9   :  { %v820_v17 = vpop.permute.xlu0 %819 }
0x10da   :  { %2329 = vmatmul.mubr.msk.f32.vlgmr.msra.gmra.mrb[6].mxu1 %vm196_vm3, %v820_v17 }
0x10db   :  { %2503 = vmatpush3.bf16.msra.mxu1 %v2500_v57 }
0x10dc   :  { %2505 = vmatprep.subr.bf16.mxu1 %v2504_v62 }
0x10df   :  { %2507 = vmatpush3.bf16.msra.mxu1 %v2504_v62 }
0x10e0   :  { %2514 = vmatprep.subr.bf16.mxu1 %v2842_v0 }
0x11ad   :  { %v889_v18 = vpop.f32.mrb[6].mxu1 }
0x11ae   :  { %v894_v19 = vrot.slane %v889_v18, 4  ;;  %v2330_v20 = vpop.f32.mrb[7].mxu1 }
0x11b0   :  { %v896_v21 = vadd.f32 %v894_v19, %v3029_v14 }
0x11b2   :  { %2612 = vtanh.f32 %v896_v21  ;;  %v897_v23 = vmul.f32 0.5, %v896_v21 }
0x11b4   :  { %2614 = vtanh.f32 %v897_v23 }
0x11bc   :  { %v2613_v22 = vpop.eup %2612 }
0x11bd   :  { %907 = vrot.lane.b32.xlu1 %v2613_v22, %s2845_s19 }
0x11be   :  { %v2615_v24 = vpop.eup %2614 }
0x11bf   :  { %v899_v25 = vadd.f32 1.0, %v2615_v24 }
0x11c1   :  { %v900_v26 = vmul.f32 0.5, %v899_v25 }
0x11c3   :  { %v905_v30 = vmul.f32 %v903_v29, %v900_v26 }
0x122f   :  { %v908_v27 = vpop.permute.xlu1 %907 }
0x1230   :  { %v910_v28 = vmul.f32 %v908_v27, %v900_v26 }
0x1232   :  { %912 = vrot.lane.b32.xlu0 %v910_v28, %s2838_s20 }
0x12a4   :  { %v913_v31 = vpop.permute.xlu0 %912 }
0x12a5   :  { %v915_v32 = vadd.f32 %v913_v31, %v905_v30 }
0x12a7   :  { %2616 = vtanh.f32 %v915_v32  ;;  %v1008_v51 = vrot.slane %v915_v32, 6 }
0x12b1   :  { %v2617_v33 = vpop.eup %2616 }
0x12b2   :  { %918 = vrot.lane.b32.xlu1 %v2617_v33, %s2845_s19 }
0x1324   :  { %v919_v34 = vpop.permute.xlu1 %918 }
0x1325   :  { %v921_v35 = vmul.f32 %v919_v34, %v900_v26 }
0x1327   :  { %v923_v36 = vrot.slane %v921_v35, 4  ;;  %v1044_v37 = vsel %vm115_vm1, %v1043_v16, %v921_v35 }
0x1329   :  { %924 = vrot.lane.b32.xlu0 %v923_v36, %s2838_s20 }
0x139b   :  { %v925_v39 = vpop.permute.xlu0 %924 }
0x139c   :  { %2340 = vmatmul.mubr.msk.f32.vlgmr.msra.gmra.mrb[8].mxu0 %vm196_vm3, %v925_v39 }
0x139d   :  { %2361 = vmatprep.mubr.msk.f32.mxu0 %vm2843_vm0, %v2844_v1 }
0x146f   :  { %v994_v40 = vpop.f32.mrb[8].mxu0 }
0x1470   :  { %v999_v41 = vrot.slane %v994_v40, 2  ;;  %v2341_v42 = vpop.f32.mrb[9].mxu0 }
0x1472   :  { %v1001_v43 = vadd.f32 %v999_v41, %v3029_v14 }
0x1474   :  { %2618 = vtanh.f32 %v1001_v43  ;;  %v1002_v45 = vmul.f32 0.5, %v1001_v43 }
0x1476   :  { %2620 = vtanh.f32 %v1002_v45 }
0x147e   :  { %v2619_v44 = vpop.eup %2618 }
0x147f   :  { %1012 = vrot.lane.b32.xlu1 %v2619_v44, %s2845_s19 }
0x1480   :  { %v2621_v46 = vpop.eup %2620 }
0x1481   :  { %v1004_v47 = vadd.f32 1.0, %v2621_v46 }
0x1483   :  { %v1005_v48 = vmul.f32 0.5, %v1004_v47 }
0x1485   :  { %v1010_v52 = vmul.f32 %v1008_v51, %v1005_v48 }
0x14f1   :  { %v1013_v49 = vpop.permute.xlu1 %1012 }
0x14f2   :  { %v1015_v50 = vmul.f32 %v1013_v49, %v1005_v48 }
0x14f4   :  { %1017 = vrot.lane.b32.xlu0 %v1015_v50, %s2838_s20 }
0x14f8   :  { %1063 = vrot.lane.b32.xlu0 %v3081_v38, %s2838_s20  ;;  %v1050_v38 = vld [vmem:[%s3333_s7] sm:$0xff] }
0x14f9   :  { %v3145_v61 = vpack.c.bf16 %v1051_v58, %v1050_v38 }
0x14fb   :  { %2510 = vmatpush3.bf16.msra.mxu0 %v3145_v61 }
0x14fc   :  { %2511 = vmatprep.subr.bf16.mxu0 %v2842_v0 }
0x14ff   :  { %2513 = vmatpush3.bf16.msra.mxu0 %v3154_v2 }
0x1500   :  { %2520 = vmatprep.subr.bf16.mxu0 %v2842_v0 }
0x1502   :  { %2362 = vmatmul.mubr.msk.f32.vlgmr.msra.gmra.mrb[10].mxu0 %vm196_vm3, %v1147_v4 }
0x1503   :  { %2522 = vmatpush3.bf16.msra.mxu0 %v3145_v61  ;;  %2383 = vmatprep.mubr.msk.f32.mxu0 %vm2843_vm0, %v2844_v1 }
0x1504   :  { %2523 = vmatprep.subr.bf16.mxu0 %v2842_v0 }
0x1507   :  { %2525 = vmatpush3.bf16.msra.mxu0 %v3154_v2 }
0x1508   :  { %2532 = vmatprep.subr.bf16.mxu0 %v2842_v0 }
0x1566   :  { %v1018_v53 = vpop.permute.xlu0 %1017 }
0x1567   :  { %v3123_v14 = vadd.f32 %v1018_v53, %v1010_v52 }
0x1569   :  { %2622 = vtanh.f32 %v3123_v14 }
0x156a   :  { %v1064_v54 = vpop.permute.xlu0 %1063 }
0x156b   :  { %2350 = vmatprep.mubr.msk.f32.mxu1 %vm196_vm3, %v1064_v54 }
0x1573   :  { %v2623_v3 = vpop.eup %2622 }
0x1574   :  { %1023 = vrot.lane.b32.xlu1 %v2623_v3, %s2845_s19 }
0x15d5   :  { %v1219_v11 = vpop.f32.mrb[10].mxu0 }
0x15d6   :  { %v2363_v12 = vpop.f32.mrb[11].mxu0 }
0x15e6   :  { %v1024_v6 = vpop.permute.xlu1 %1023 }
0x15e7   :  { %v3168_v10 = vmul.f32 %v1024_v6, %v1005_v48 }
0x15e9   :  { %v1045_v7 = vsel %vm1041_vm5, %v1044_v37, %v3168_v10 }
0x15ea   :  { %1065 = vrot.lane.b32.xlu1 %v1045_v7, %s2838_s20 }
0x15ee   :  { %1230 = vrot.lane.b32.xlu1 %v1149_v8, %s2838_s20 }
0x165c   :  { %v1066_v9 = vpop.permute.xlu1 %1065 }
0x165d   :  { %2351 = vmatmul.mubr.msk.f32.vlgmr.msra.gmra.mrb[8].mxu1 %vm196_vm3, %v1066_v9 }
0x165e   :  { %2516 = vmatpush3.bf16.msra.mxu1 %v3145_v61  ;;  %2372 = vmatprep.mubr.msk.f32.mxu1 %vm2843_vm0, %v2844_v1 }
0x165f   :  { %2517 = vmatprep.subr.bf16.mxu1 %v2842_v0 }
0x1660   :  { %v1231_v28 = vpop.permute.xlu1 %1230 }
0x1662   :  { %2519 = vmatpush3.bf16.msra.mxu1 %v3154_v2 }
0x1663   :  { %2526 = vmatprep.subr.bf16.mxu1 %v2842_v0 }
0x1730   :  { %v2352_v15 = vpop.f32.mrb[8].mxu1 }
0x1731   :  { %v3184_v17 = vadd.f32 %v2352_v15, %v2142_v13  ;;  %v1137_v18 = vpop.f32.mrb[9].mxu1 }
0x1732   :  { %v3186_v19 = vadd.f32 %v2142_v13, %v1137_v18 }
0x1734   :  { %v1223_v20 = vadd.f32 %v1219_v11, %v3186_v19 }
0x1736   :  { %2624 = vtanh.f32 %v1223_v20  ;;  %v1224_v22 = vmul.f32 0.5, %v1223_v20 }
0x1738   :  { %2626 = vtanh.f32 %v1224_v22 }
0x1740   :  { %v2625_v21 = vpop.eup %2624 }
0x1741   :  { %1235 = vrot.lane.b32.xlu0 %v2625_v21, %s2845_s19 }
0x1742   :  { %v2627_v23 = vpop.eup %2626 }
0x1743   :  { %v1226_v24 = vadd.f32 1.0, %v2627_v23 }
0x1745   :  { %v1227_v25 = vmul.f32 0.5, %v1226_v24 }
0x1747   :  { %v1233_v29 = vmul.f32 %v1231_v28, %v1227_v25 }
0x17b3   :  { %v1236_v26 = vpop.permute.xlu0 %1235 }
0x17b4   :  { %v1238_v27 = vmul.f32 %v1236_v26, %v1227_v25 }
0x17b6   :  { %1240 = vrot.lane.b32.xlu0 %v1238_v27, %s2838_s20 }
0x1828   :  { %v1241_v30 = vpop.permute.xlu0 %1240 }
0x1829   :  { %v1243_v31 = vadd.f32 %v1241_v30, %v1233_v29 }
0x182b   :  { %2628 = vtanh.f32 %v1243_v31  ;;  %v1335_v47 = vrot.slane %v1243_v31, 6 }
0x1835   :  { %v2629_v32 = vpop.eup %2628 }
0x1836   :  { %1246 = vrot.lane.b32.xlu1 %v2629_v32, %s2845_s19 }
0x18a8   :  { %v1247_v33 = vpop.permute.xlu1 %1246 }
0x18a9   :  { %v1249_v34 = vmul.f32 %v1247_v33, %v1227_v25 }
0x18ab   :  { %1251 = vrot.lane.b32.xlu0 %v1249_v34, %s2838_s20 }
0x191d   :  { %v1252_v35 = vpop.permute.xlu0 %1251 }
0x191e   :  { %2373 = vmatmul.mubr.msk.f32.vlgmr.msra.gmra.mrb[10].mxu1 %vm196_vm3, %v1252_v35 }
0x191f   :  { %2528 = vmatpush3.bf16.msra.mxu1 %v3145_v61  ;;  %2394 = vmatprep.mubr.msk.f32.mxu1 %vm2843_vm0, %v2844_v1 }
0x1920   :  { %2529 = vmatprep.subr.bf16.mxu1 %v2842_v0 }
0x1923   :  { %2531 = vmatpush3.bf16.msra.mxu1 %v3154_v2 }
0x1924   :  { %2538 = vmatprep.subr.bf16.mxu1 %v2842_v0 }
0x19f1   :  { %v1321_v16 = vpop.f32.mrb[10].mxu1 }
0x19f2   :  { %v1326_v36 = vrot.slane %v1321_v16, 6  ;;  %v2374_v37 = vpop.f32.mrb[11].mxu1 }
0x19f4   :  { %v1328_v39 = vadd.f32 %v1326_v36, %v3186_v19 }
0x19f6   :  { %2630 = vtanh.f32 %v1328_v39  ;;  %v1329_v41 = vmul.f32 0.5, %v1328_v39 }
0x19f8   :  { %2632 = vtanh.f32 %v1329_v41 }
0x1a00   :  { %v2631_v40 = vpop.eup %2630 }
0x1a01   :  { %1339 = vrot.lane.b32.xlu1 %v2631_v40, %s2845_s19 }
0x1a02   :  { %v2633_v42 = vpop.eup %2632 }
0x1a03   :  { %v1331_v43 = vadd.f32 1.0, %v2633_v42 }
0x1a05   :  { %v1332_v44 = vmul.f32 0.5, %v1331_v43 }
0x1a07   :  { %v1337_v48 = vmul.f32 %v1335_v47, %v1332_v44 }
0x1a73   :  { %v1340_v45 = vpop.permute.xlu1 %1339 }
0x1a74   :  { %v1342_v46 = vmul.f32 %v1340_v45, %v1332_v44 }
0x1a76   :  { %1344 = vrot.lane.b32.xlu0 %v1342_v46, %s2838_s20 }
0x1ae8   :  { %v1345_v49 = vpop.permute.xlu0 %1344 }
0x1ae9   :  { %v1347_v50 = vadd.f32 %v1345_v49, %v1337_v48 }
0x1aeb   :  { %2634 = vtanh.f32 %v1347_v50  ;;  %v1440_v6 = vrot.slane %v1347_v50, 6 }
0x1af5   :  { %v2635_v51 = vpop.eup %2634 }
0x1af6   :  { %1350 = vrot.lane.b32.xlu1 %v2635_v51, %s2845_s19 }
0x1b68   :  { %v1351_v52 = vpop.permute.xlu1 %1350 }
0x1b69   :  { %v1353_v53 = vmul.f32 %v1351_v52, %v1332_v44 }
0x1b6b   :  { %v1355_v54 = vrot.slane %v1353_v53, 2 }
0x1b6d   :  { %1356 = vrot.lane.b32.xlu0 %v1355_v54, %s2838_s20 }
0x1bdf   :  { %v1357_v55 = vpop.permute.xlu0 %1356 }
0x1be0   :  { %2384 = vmatmul.mubr.msk.f32.vlgmr.msra.gmra.mrb[12].mxu0 %vm196_vm3, %v1357_v55 }
0x1be1   :  { %2534 = vmatpush3.bf16.msra.mxu0 %v3145_v61  ;;  %2405 = vmatprep.mubr.msk.f32.mxu0 %vm2843_vm0, %v2844_v1 }
0x1be2   :  { %2535 = vmatprep.subr.bf16.mxu0 %v2842_v0 }
0x1be5   :  { %2537 = vmatpush3.bf16.msra.mxu0 %v3154_v2 }
0x1be6   :  { %2544 = vmatprep.subr.bf16.mxu0 %v2842_v0 }
0x1cb3   :  { %v1426_v56 = vpop.f32.mrb[12].mxu0 }
0x1cb4   :  { %v1431_v38 = vrot.slane %v1426_v56, 4  ;;  %v2385_v57 = vpop.f32.mrb[13].mxu0 }
0x1cb6   :  { %v1433_v58 = vadd.f32 %v1431_v38, %v3186_v19 }
0x1cb8   :  { %2636 = vtanh.f32 %v1433_v58  ;;  %v1434_v60 = vmul.f32 0.5, %v1433_v58 }
0x1cba   :  { %2638 = vtanh.f32 %v1434_v60 }
0x1cc2   :  { %v2637_v59 = vpop.eup %2636 }
0x1cc3   :  { %1444 = vrot.lane.b32.xlu1 %v2637_v59, %s2845_s19 }
0x1cc4   :  { %v2639_v62 = vpop.eup %2638 }
0x1cc5   :  { %v1436_v63 = vadd.f32 1.0, %v2639_v62 }
0x1cc7   :  { %v1437_v5 = vmul.f32 0.5, %v1436_v63 }
0x1cc9   :  { %v1442_v7 = vmul.f32 %v1440_v6, %v1437_v5 }
0x1d35   :  { %v1445_v3 = vpop.permute.xlu1 %1444 }
0x1d36   :  { %v1447_v4 = vmul.f32 %v1445_v3, %v1437_v5 }
0x1d38   :  { %1449 = vrot.lane.b32.xlu0 %v1447_v4, %s2838_s20 }
0x1daa   :  { %v1450_v8 = vpop.permute.xlu0 %1449 }
0x1dab   :  { %v1452_v9 = vadd.f32 %v1450_v8, %v1442_v7 }
0x1dad   :  { %2640 = vtanh.f32 %v1452_v9  ;;  %v1545_v31 = vrot.slane %v1452_v9, 6 }
0x1db7   :  { %v2641_v11 = vpop.eup %2640 }
0x1db8   :  { %1455 = vrot.lane.b32.xlu1 %v2641_v11, %s2845_s19 }
0x1e2a   :  { %v1456_v12 = vpop.permute.xlu1 %1455 }
0x1e2b   :  { %v1458_v13 = vmul.f32 %v1456_v12, %v1437_v5 }
0x1e2d   :  { %v1460_v15 = vrot.slane %v1458_v13, 4 }
0x1e2f   :  { %1461 = vrot.lane.b32.xlu0 %v1460_v15, %s2838_s20 }
0x1ea1   :  { %v1462_v18 = vpop.permute.xlu0 %1461 }
0x1ea2   :  { %2395 = vmatmul.mubr.msk.f32.vlgmr.msra.gmra.mrb[12].mxu1 %vm196_vm3, %v1462_v18 }
0x1ea3   :  { %2540 = vmatpush3.bf16.msra.mxu1 %v3145_v61  ;;  %2416 = vmatprep.mubr.msk.f32.mxu1 %vm2843_vm0, %v2844_v1 }
0x1ea4   :  { %2541 = vmatprep.subr.bf16.mxu1 %v2842_v0 }
0x1ea7   :  { %2543 = vmatpush3.bf16.msra.mxu1 %v3154_v2 }
0x1ea8   :  { %2550 = vmatprep.subr.bf16.mxu1 %v2842_v0 }
0x1f75   :  { %v1531_v20 = vpop.f32.mrb[12].mxu1 }
0x1f76   :  { %v1536_v21 = vrot.slane %v1531_v20, 2  ;;  %v2396_v22 = vpop.f32.mrb[13].mxu1 }
0x1f78   :  { %v1538_v23 = vadd.f32 %v1536_v21, %v3186_v19 }
0x1f7a   :  { %2642 = vtanh.f32 %v1538_v23  ;;  %v1539_v25 = vmul.f32 0.5, %v1538_v23 }
0x1f7c   :  { %2644 = vtanh.f32 %v1539_v25 }
0x1f84   :  { %v2643_v24 = vpop.eup %2642 }
0x1f85   :  { %1549 = vrot.lane.b32.xlu1 %v2643_v24, %s2845_s19 }
0x1f86   :  { %v2645_v26 = vpop.eup %2644 }
0x1f87   :  { %v1541_v27 = vadd.f32 1.0, %v2645_v26 }
0x1f89   :  { %v1542_v28 = vmul.f32 0.5, %v1541_v27 }
0x1f8b   :  { %v1547_v32 = vmul.f32 %v1545_v31, %v1542_v28 }
0x1ff7   :  { %v1550_v29 = vpop.permute.xlu1 %1549 }
0x1ff8   :  { %v1552_v30 = vmul.f32 %v1550_v29, %v1542_v28 }
0x1ffa   :  { %1554 = vrot.lane.b32.xlu0 %v1552_v30, %s2838_s20 }
0x206c   :  { %v1555_v33 = vpop.permute.xlu0 %1554 }
0x206d   :  { %v1557_v34 = vadd.f32 %v1555_v33, %v1547_v32 }
0x206f   :  { %2646 = vtanh.f32 %v1557_v34  ;;  %v1647_v49 = vrot.slane %v1557_v34, 6 }
0x2079   :  { %v2647_v35 = vpop.eup %2646 }
0x207a   :  { %1560 = vrot.lane.b32.xlu1 %v2647_v35, %s2845_s19 }
0x20ec   :  { %v1561_v19 = vpop.permute.xlu1 %1560 }
0x20ed   :  { %v1563_v16 = vmul.f32 %v1561_v19, %v1542_v28 }
0x20ef   :  { %v1565_v36 = vrot.slane %v1563_v16, 6 }
0x20f1   :  { %1566 = vrot.lane.b32.xlu0 %v1565_v36, %s2838_s20 }
0x2163   :  { %v1567_v37 = vpop.permute.xlu0 %1566 }
0x2164   :  { %2406 = vmatmul.mubr.msk.f32.vlgmr.msra.gmra.mrb[14].mxu0 %vm196_vm3, %v1567_v37 }
0x2165   :  { %2546 = vmatpush3.bf16.msra.mxu0 %v3145_v61  ;;  %2427 = vmatprep.mubr.msk.f32.mxu0 %vm2843_vm0, %v2844_v1 }
0x2166   :  { %2547 = vmatprep.subr.bf16.mxu0 %v2842_v0 }
0x2169   :  { %2549 = vmatpush3.bf16.msra.mxu0 %v3154_v2 }
0x216a   :  { %2556 = vmatprep.subr.bf16.mxu0 %v2842_v0 }
0x2237   :  { %v1636_v39 = vpop.f32.mrb[14].mxu0 }
0x2238   :  { %v1640_v40 = vadd.f32 %v1636_v39, %v3184_v17  ;;  %v2407_v41 = vpop.f32.mrb[15].mxu0 }
0x223a   :  { %2648 = vtanh.f32 %v1640_v40  ;;  %v1641_v43 = vmul.f32 0.5, %v1640_v40 }
0x223c   :  { %2650 = vtanh.f32 %v1641_v43 }
0x2244   :  { %v2649_v42 = vpop.eup %2648 }
0x2245   :  { %1651 = vrot.lane.b32.xlu1 %v2649_v42, %s2845_s19 }
0x2246   :  { %v2651_v44 = vpop.eup %2650 }
0x2247   :  { %v1643_v45 = vadd.f32 1.0, %v2651_v44 }
0x2249   :  { %v1644_v46 = vmul.f32 0.5, %v1643_v45 }
0x224b   :  { %v1649_v50 = vmul.f32 %v1647_v49, %v1644_v46 }
0x22b7   :  { %v1652_v47 = vpop.permute.xlu1 %1651 }
0x22b8   :  { %v1654_v48 = vmul.f32 %v1652_v47, %v1644_v46 }
0x22ba   :  { %1656 = vrot.lane.b32.xlu0 %v1654_v48, %s2838_s20 }
0x232c   :  { %v1657_v51 = vpop.permute.xlu0 %1656 }
0x232d   :  { %v1659_v52 = vadd.f32 %v1657_v51, %v1649_v50 }
0x232f   :  { %2652 = vtanh.f32 %v1659_v52  ;;  %v1751_v6 = vrot.slane %v1659_v52, 6 }
0x2339   :  { %v2653_v53 = vpop.eup %2652 }
0x233a   :  { %1662 = vrot.lane.b32.xlu1 %v2653_v53, %s2845_s19  ;;  %v1994_v53 = vld [vmem:[%s3335_s9 + $0x8] sm:$0xff] }
0x23ac   :  { %v1663_v54 = vpop.permute.xlu1 %1662 }
0x23ad   :  { %v1665_v55 = vmul.f32 %v1663_v54, %v1644_v46  ;;  %v1995_v54 = vld [vmem:[%s3335_s9 + $0x10] sm:$0xff] }
0x23af   :  { %1667 = vrot.lane.b32.xlu0 %v1665_v55, %s2838_s20 }
0x2421   :  { %v1668_v56 = vpop.permute.xlu0 %1667 }
0x2422   :  { %2417 = vmatmul.mubr.msk.f32.vlgmr.msra.gmra.mrb[14].mxu1 %vm196_vm3, %v1668_v56  ;;  %v1996_v56 = vld [vmem:[%s3335_s9 + $0x18] sm:$0xff] }
0x2423   :  { %2552 = vmatpush3.bf16.msra.mxu1 %v3145_v61  ;;  %2438 = vmatprep.mubr.msk.f32.mxu1 %vm2843_vm0, %v2844_v1 }
0x2424   :  { %2553 = vmatprep.subr.bf16.mxu1 %v2842_v0 }
0x2427   :  { %2555 = vmatpush3.bf16.msra.mxu1 %v3154_v2 }
0x24f5   :  { %v1737_v38 = vpop.f32.mrb[14].mxu1 }
0x24f6   :  { %v1742_v57 = vrot.slane %v1737_v38, 6  ;;  %v2418_v58 = vpop.f32.mrb[15].mxu1  ;;  %v2560_v38 = vpack.c.bf16 %v1996_v56, %v1995_v54 }
0x24f8   :  { %v1744_v59 = vadd.f32 %v1742_v57, %v3184_v17 }
0x24fa   :  { %2654 = vtanh.f32 %v1744_v59  ;;  %v1745_v62 = vmul.f32 0.5, %v1744_v59 }
0x24fc   :  { %2656 = vtanh.f32 %v1745_v62 }
0x2504   :  { %v2655_v60 = vpop.eup %2654 }
0x2505   :  { %1755 = vrot.lane.b32.xlu1 %v2655_v60, %s2845_s19 }
0x2506   :  { %v2657_v63 = vpop.eup %2656 }
0x2507   :  { %v1747_v61 = vadd.f32 1.0, %v2657_v63 }
0x2509   :  { %v1748_v5 = vmul.f32 0.5, %v1747_v61 }
0x250b   :  { %v1753_v2 = vmul.f32 %v1751_v6, %v1748_v5 }
0x2577   :  { %v1756_v3 = vpop.permute.xlu1 %1755 }
0x2578   :  { %v1758_v4 = vmul.f32 %v1756_v3, %v1748_v5 }
0x257a   :  { %1760 = vrot.lane.b32.xlu0 %v1758_v4, %s2838_s20 }
0x25ec   :  { %v1761_v7 = vpop.permute.xlu0 %1760 }
0x25ed   :  { %v1763_v8 = vadd.f32 %v1761_v7, %v1753_v2 }
0x25ef   :  { %2658 = vtanh.f32 %v1763_v8  ;;  %v1856_v30 = vrot.slane %v1763_v8, 6 }
0x25f9   :  { %v2659_v9 = vpop.eup %2658 }
0x25fa   :  { %1766 = vrot.lane.b32.xlu1 %v2659_v9, %s2845_s19 }
0x266c   :  { %v1767_v11 = vpop.permute.xlu1 %1766 }
0x266d   :  { %v1769_v12 = vmul.f32 %v1767_v11, %v1748_v5 }
0x266f   :  { %v1771_v13 = vrot.slane %v1769_v12, 2 }
0x2671   :  { %1772 = vrot.lane.b32.xlu0 %v1771_v13, %s2838_s20 }
0x26e3   :  { %v1773_v15 = vpop.permute.xlu0 %1772 }
0x26e4   :  { %2428 = vmatmul.mubr.msk.f32.vlgmr.msra.gmra.mrb[16].mxu0 %vm196_vm3, %v1773_v15 }
0x26e5   :  { %2449 = vmatprep.mubr.msk.f32.mxu0 %vm2843_vm0, %v2844_v1 }
0x27b7   :  { %v1842_v18 = vpop.f32.mrb[16].mxu0 }
0x27b8   :  { %v1847_v20 = vrot.slane %v1842_v18, 4  ;;  %v2429_v21 = vpop.f32.mrb[17].mxu0 }
0x27ba   :  { %v1849_v22 = vadd.f32 %v1847_v20, %v3184_v17 }
0x27bc   :  { %2660 = vtanh.f32 %v1849_v22  ;;  %v1850_v24 = vmul.f32 0.5, %v1849_v22 }
0x27be   :  { %2662 = vtanh.f32 %v1850_v24 }
0x27c6   :  { %v2661_v23 = vpop.eup %2660 }
0x27c7   :  { %1860 = vrot.lane.b32.xlu1 %v2661_v23, %s2845_s19 }
0x27c8   :  { %v2663_v25 = vpop.eup %2662 }
0x27c9   :  { %v1852_v26 = vadd.f32 1.0, %v2663_v25 }
0x27cb   :  { %v1853_v27 = vmul.f32 0.5, %v1852_v26 }
0x27cd   :  { %v1858_v1 = vmul.f32 %v1856_v30, %v1853_v27 }
0x2839   :  { %v1861_v28 = vpop.permute.xlu1 %1860 }
0x283a   :  { %v1863_v29 = vmul.f32 %v1861_v28, %v1853_v27 }
0x283c   :  { %1865 = vrot.lane.b32.xlu0 %v1863_v29, %s2838_s20 }
0x28ae   :  { %v1866_v31 = vpop.permute.xlu0 %1865 }
0x28af   :  { %v1868_v32 = vadd.f32 %v1866_v31, %v1858_v1 }
0x28b1   :  { %2664 = vtanh.f32 %v1868_v32  ;;  %v1961_v48 = vrot.slane %v1868_v32, 6 }
0x28bb   :  { %v2665_v33 = vpop.eup %2664 }
0x28bc   :  { %1871 = vrot.lane.b32.xlu1 %v2665_v33, %s2845_s19 }
0x292e   :  { %v1872_v34 = vpop.permute.xlu1 %1871 }
0x292f   :  { %v1874_v35 = vmul.f32 %v1872_v34, %v1853_v27 }
0x2931   :  { %v1876_v19 = vrot.slane %v1874_v35, 4 }
0x2933   :  { %1877 = vrot.lane.b32.xlu0 %v1876_v19, %s2838_s20 }
0x29a5   :  { %v1878_v16 = vpop.permute.xlu0 %1877 }
0x29a6   :  { %2439 = vmatmul.mubr.msk.f32.vlgmr.msra.gmra.mrb[16].mxu1 %vm196_vm3, %v1878_v16 }
0x2a79   :  { %v1947_v36 = vpop.f32.mrb[16].mxu1 }
0x2a7a   :  { %v1952_v37 = vrot.slane %v1947_v36, 2  ;;  %v2440_v39 = vpop.f32.mrb[17].mxu1 }
0x2a7c   :  { %v1954_v40 = vadd.f32 %v1952_v37, %v3184_v17  ;;  %v1993_v17 = vld [vmem:[%s3335_s9] sm:$0xff]  ;;  %s2847_s9 = smov [#allocation11]  }
0x2a7d   :  { %v2557_v55 = vpack.c.bf16 %v1994_v53, %v1993_v17  ;;  %s2097_s24 = sshll.u32 %s2847_s9, 4  ;;  %s2098_s24 = int_to_ptr.vmem [resolvable:$true] %s2097_s24 }
0x2a7e   :  { %2666 = vtanh.f32 %v1954_v40  ;;  %v1955_v42 = vmul.f32 0.5, %v1954_v40  ;;  %s2760_s25 = scalar_lea.vmem %s2098_s24, 64  ;;  %p2765_p5 = scmp.lt.s32.totalorder %s2098_s24, %s2098_s24 }
0x2a7f   :  { %2558 = vmatpush3.bf16.msra.mxu0 %v2557_v55  ;;  %p2761_p4 = scmp.ne.s32.totalorder %s2098_s24, %s2760_s25  ;;  %p2766_p6 = scmp.lt.s32.totalorder %s2760_s25, %s2760_s25 }
0x2a80   :  { %2668 = vtanh.f32 %v1955_v42  ;;  %2559 = vmatprep.subr.bf16.mxu0 %v2842_v0 }
0x2a81   :  { %p2767_p7 = por %p2766_p6, %p2765_p5 }
0x2a83   :  { %2561 = vmatpush3.bf16.msra.mxu0 %v2560_v38  ;;  %p2768_p8 = pnand %p2767_p7, %p2761_p4 }
0x2a88   :  { %v2667_v41 = vpop.eup %2666 }
0x2a89   :  { %1965 = vrot.lane.b32.xlu1 %v2667_v41, %s2845_s19 }
0x2a8a   :  { %v2669_v43 = vpop.eup %2668 }
0x2a8b   :  { %v1957_v44 = vadd.f32 1.0, %v2669_v43 }
0x2a8d   :  { %v1958_v45 = vmul.f32 0.5, %v1957_v44 }
0x2a8f   :  { %v1963_v49 = vmul.f32 %v1961_v48, %v1958_v45 }
0x2afb   :  { %v1966_v46 = vpop.permute.xlu1 %1965 }
0x2afc   :  { %v1968_v47 = vmul.f32 %v1966_v46, %v1958_v45 }
0x2afe   :  { %1970 = vrot.lane.b32.xlu0 %v1968_v47, %s2838_s20 }
0x2b70   :  { %v1971_v50 = vpop.permute.xlu0 %1970 }
0x2b71   :  { %v1973_v51 = vadd.f32 %v1971_v50, %v1963_v49 }
0x2b73   :  { %2670 = vtanh.f32 %v1973_v51 }
0x2b7d   :  { %v2671_v52 = vpop.eup %2670 }
0x2b7e   :  { %1976 = vrot.lane.b32.xlu1 %v2671_v52, %s2845_s19  ;;  %s2846_s19 = smov 96  }
0x2b82   :  { %1028 = vrot.lane.b32.xlu1 %v3168_v10, %s2838_s20 }
0x2b86   :  { %1034 = vrot.lane.b32.xlu1 %v3123_v14, %s2846_s19 }
0x2bf0   :  { %v1977_v57 = vpop.permute.xlu1 %1976 }
0x2bf1   :  { %v1979_v58 = vmul.f32 %v1977_v57, %v1958_v45 }
0x2bf3   :  { %v1992_v59 = vmax.f32 %v1979_v58, 0.0 }
0x2bf4   :  { %v1029_v60 = vpop.permute.xlu1 %1028 }
0x2bf5   :  { %1032 = vst.msk [vmem:[#allocation11 - $0x6] sm:$0xc0] %vm1031_vm6, %v1029_v60  ;;  %v2005_v62 = vrot.slane %v1992_v59, 6 }
0x2bf7   :  { %2006 = vrot.lane.b32.xlu0 %v2005_v62, %s2838_s20 }
0x2bf8   :  { %v1035_v63 = vpop.permute.xlu1 %1034 }
0x2bf9   :  { %1037 = vst.msk [vmem:[#allocation13 - $0x6] sm:$0xc0] %vm1031_vm6, %v1035_v63 }
0x2bfb   :  { %1981 = vrot.lane.b32.xlu0 %v1979_v58, %s2838_s20 }
0x2bff   :  { %1987 = vrot.lane.b32.xlu0 %v1973_v51, %s2846_s19 }
0x2c69   :  { %v2007_v10 = vpop.permute.xlu0 %2006 }
0x2c6a   :  { %2450 = vmatmul.mubr.msk.f32.vlgmr.msra.gmra.mrb[18].mxu0 %vm196_vm3, %v2007_v10 }
0x2c6d   :  { %v1982_v0 = vpop.permute.xlu0 %1981 }
0x2c6e   :  { %1985 = vst.msk [vmem:[#allocation11 - $0x4] sm:$0xc0] %vm1031_vm6, %v1982_v0 }
0x2c71   :  { %v1988_v14 = vpop.permute.xlu0 %1987 }
0x2c72   :  { %1991 = vst.msk [vmem:[#allocation13 - $0x4] sm:$0xc0] %vm1031_vm6, %v1988_v14 }
0x2c73   :  { %2771 = shalt.err (!%p2768_p8)
}
0x2c74   :  { %s2772_s18 = scalar_lea.hbm %s3338_s12, 64 }
0x2c75   :  { %p2773_p9 = scmp.ne.s32.totalorder %s3338_s12, %s2772_s18  ;;  %p2776_p10 = scmp.lt.u32.totalorder %s2772_s18, %s3338_s12 }
0x2c77   :  { %p2778_p11 = pnand %p2776_p10, %p2773_p9 }
0x2c79   :  { %2781 = shalt.err (!%p2778_p11)
}
0x2c7a   :  { %2103 = dma.vmem_to_hbm [thread:$0]  %s2098_s24, 64, %s3338_s12, [#allocation12], %s2838_s20, %s2838_s20, %s2839_s21  }
0x2c7b   :  { %s2848_s28 = smov [#allocation13]  }
0x2c7c   :  { %s2109_s15 = sshll.u32 %s2848_s28, 4  ;;  %s2110_s15 = int_to_ptr.vmem [resolvable:$true] %s2109_s15 }
0x2c7d   :  { %s2782_s16 = scalar_lea.vmem %s2110_s15, 64  ;;  %p2787_p13 = scmp.lt.s32.totalorder %s2110_s15, %s2110_s15 }
0x2c7e   :  { %p2783_p12 = scmp.ne.s32.totalorder %s2110_s15, %s2782_s16  ;;  %p2788_p0 = scmp.lt.s32.totalorder %s2782_s16, %s2782_s16 }
0x2c80   :  { %p2789_p1 = por %p2788_p0, %p2787_p13 }
0x2c82   :  { %p2790_p2 = pnand %p2789_p1, %p2783_p12 }
0x2c84   :  { %2793 = shalt.err (!%p2790_p2)
}
0x2c85   :  { %s2794_s8 = scalar_lea.hbm %s3339_s13, 64 }
0x2c86   :  { %p2795_p3 = scmp.ne.s32.totalorder %s3339_s13, %s2794_s8  ;;  %p2798_p4 = scmp.lt.u32.totalorder %s2794_s8, %s3339_s13 }
0x2c88   :  { %p2800_p5 = pnand %p2798_p4, %p2795_p3 }
0x2c8a   :  { %2803 = shalt.err (!%p2800_p5)
}
0x2c8b   :  { %2115 = dma.vmem_to_hbm [thread:$0]  %s2110_s15, 64, %s3339_s13, [#allocation12], %s2838_s20, %s2838_s20, %s2839_s21   ;;  %v2153_v61 = vld [vmem:[#allocation8] ss:$0 sm:$0xff]  ;;  %vm2080_vm7 = vcmask 25600  }
0x2c8c   :  { %s2849_s5 = smov [#allocation10]  }
0x2c8d   :  { %s2088_s23 = sshll.u32 %s2849_s5, 4  ;;  %s2089_s23 = int_to_ptr.vmem [resolvable:$true] %s2088_s23 }
0x2c8e   :  { %s2804_s19 = scalar_lea.vmem %s2089_s23, 32  ;;  %p2809_p7 = scmp.lt.s32.totalorder %s2089_s23, %s2089_s23 }
0x2c8f   :  { %p2805_p6 = scmp.ne.s32.totalorder %s2089_s23, %s2804_s19  ;;  %p2810_p8 = scmp.lt.s32.totalorder %s2804_s19, %s2804_s19 }
0x2c91   :  { %p2811_p9 = por %p2810_p8, %p2809_p7 }
0x2c93   :  { %p2812_p10 = pnand %p2811_p9, %p2805_p6 }
0x2d3d   :  { %v2076_v5 = vpop.f32.mrb[18].mxu0 }
0x2d3e   :  { %v2077_v3 = vadd.f32 %v2153_v61, %v2076_v5  ;;  %v2451_v4 = vpop.f32.mrb[19].mxu0 }
0x2d40   :  { %2081 = vst.msk [vmem:[#allocation10] sm:$0x3] %vm2080_vm7, %v2077_v3 }
0x2d41   :  { %2815 = shalt.err (!%p2812_p10)
}
0x2d42   :  { %s2816_s13 = scalar_lea.hbm %s3337_s11, 32 }
0x2d43   :  { %p2817_p11 = scmp.ne.s32.totalorder %s3337_s11, %s2816_s13  ;;  %p2820_p12 = scmp.lt.u32.totalorder %s2816_s13, %s3337_s11 }
0x2d45   :  { %p2822_p13 = pnand %p2820_p12, %p2817_p11 }
0x2d47   :  { %2825 = shalt.err (!%p2822_p13)
}
0x2d48   :  { %2091 = dma.vmem_to_hbm [thread:$0]  %s2089_s23, 32, %s3337_s11, [#allocation4]  }
0x2d49   :  { %2832 = dma.done.wait [#allocation4], 32  }
0x2d4a   :  { %2833 = vsyncadd [#allocation4], 4294967264 }
0x2d4b   :  { %2834 = dma.done.wait [#allocation12], 128  }
0x2d4c   :  { %2835 = vsyncadd [#allocation12], 4294967168 }
0x2d4d   :  { %2125 = vsyncpa [#allocation3], 1 }
0x2d4e   :  { %2126 = vsyncpa [#allocation6], 1 }
0x2d4f   :  { %2127 = vsyncpa [#allocation9], 1 }
0x2d50   :  { %2128 = vsyncpa [#allocation4], 1 }
0x2d51   :  { %2129 = vsyncpa [#allocation12], 1 }

</bundles_post_ra>
